<compile_context>
chip_gen: v7x
topology: tpu7x:2x2x1
jax: 0.10.0
libtpu: 0.0.40
codegen_flags: <defaults>
</compile_context>

<pallas_src>
import math
from functools import partial

import jax
import jax.numpy as jnp
from jax import lax
from jax.experimental import pallas as pl
from jax.experimental.pallas import tpu as pltpu


# ---------------------------------------------------------------------------
# Kernels
# ---------------------------------------------------------------------------
def attn_kernel(x_ref, wqkv_ref, bqkv_ref, o_ref, *, head, d_model, s_len, kb, scale):
    """Fused QKV projection + multi-head attention for kb batches per grid step.

    x_ref: (kb*S, D) f32, wqkv_ref: (D, 3D) bf16, bqkv_ref: (1, 3D) f32, o_ref: (kb*S, D) bf16.
    """
    dh = d_model // head
    xb = x_ref[...].astype(jnp.bfloat16)                         # cast in-kernel (VPU)
    qkv = (jnp.dot(xb, wqkv_ref[...], preferred_element_type=jnp.float32)
           + bqkv_ref[...])                                      # (kb*S, 3D) f32, never hits HBM
    q = qkv[:, 0 * d_model:1 * d_model] * scale                  # fold 1/sqrt(dh) into q once
    k = qkv[:, 1 * d_model:2 * d_model]
    v = qkv[:, 2 * d_model:3 * d_model]

    for b in range(kb):                                          # static, compile-time unrolled
        r0 = b * s_len
        for h in range(head):
            c0 = h * dh
            qh = q[r0:r0 + s_len, c0:c0 + dh].astype(jnp.bfloat16)
            kh = k[r0:r0 + s_len, c0:c0 + dh].astype(jnp.bfloat16)
            vh = v[r0:r0 + s_len, c0:c0 + dh].astype(jnp.bfloat16)
            # contract on dh of both operands -> no explicit k.T / XLU transpose
            s = lax.dot_general(qh, kh, (((1,), (1,)), ((), ())),
                                preferred_element_type=jnp.float32)       # (S, S)
            m = jnp.max(s, axis=-1, keepdims=True)
            e = jnp.exp(s - m)
            p = e * pl.reciprocal(jnp.sum(e, axis=-1, keepdims=True), approx=True)  # EUP slot
            oh = jnp.dot(p.astype(jnp.bfloat16), vh, preferred_element_type=jnp.float32)
            # direct per-head store (no concatenate, no head-sized live values piling up)
            o_ref[r0:r0 + s_len, c0:c0 + dh] = oh.astype(o_ref.dtype)


def proj_fc_stats_kernel(att_ref, wo_ref, bo_ref, x_ref, wfc_ref, bfc_ref,
                         y_ref, h_ref, psum_ref, psq_ref):
    """Pass 1 (tiled over N, 'parallel'):
       att-out projection + residual-1 + FC matmul; per-tile BN partial sums to own blocks."""
    att = (jnp.dot(att_ref[...], wo_ref[...], preferred_element_type=jnp.float32)
           + bo_ref[...])
    y = x_ref[...] + att                                         # y = x + att(x, x, x)
    h = (jnp.dot(y.astype(jnp.bfloat16), wfc_ref[...],
                 preferred_element_type=jnp.float32) + bfc_ref[...])
    y_ref[...] = y
    h_ref[...] = h
    # per-tile partials, each grid step owns its (1,1,D) block -> safe under "parallel"
    psum_ref[...] = jnp.sum(h, axis=0, keepdims=True)[None]
    psq_ref[...] = jnp.sum(h * h, axis=0, keepdims=True)[None]


def bn_coeff_kernel(psum_ref, psq_ref, gamma_ref, beta_ref, scale_ref, shift_ref,
                    *, n_total, eps):
    """Tiny reduction: fold (grid_n,1,D) partials + gamma/beta into per-feature scale/shift."""
    inv_n = 1.0 / n_total
    mean = jnp.sum(psum_ref[...], axis=0) * inv_n                # (1, D)
    var = jnp.maximum(jnp.sum(psq_ref[...], axis=0) * inv_n - mean * mean, 0.0)
    inv_std = lax.rsqrt(var + eps)
    bn_scale = gamma_ref[...] * inv_std
    scale_ref[...] = bn_scale
    shift_ref[...] = beta_ref[...] - mean * bn_scale


def bn_relu_res_kernel(y_ref, h_ref, scale_ref, shift_ref, o_ref):
    """Pass 2 (tiled over N, 'parallel', streaming): BN apply + ReLU + residual-2."""
    z = jnp.maximum(h_ref[...] * scale_ref[...] + shift_ref[...], 0.0)
    o_ref[...] = y_ref[...] + z                                  # z = y + fc(y)


# ---------------------------------------------------------------------------
# Sizing helpers (generation-aware, (8,128)-safe)
# ---------------------------------------------------------------------------
def _largest_tile(n, cap):
    """Largest multiple-of-8 divisor of n that is <= cap; fallback: n (block == full dim, legal)."""
    for t in range(min(n, cap), 7, -1):
        if n % t == 0 and t % 8 == 0:
            return t
    return n


def _batches_per_step(batch, seq, head, row_cap=256, unroll_cap=32):
    """How many (S, D) batches a single attention grid step processes (rows must be 8-aligned)."""
    best = None
    for kb in range(1, batch + 1):
        if batch % kb:
            continue
        rows = kb * seq
        if rows % 8 == 0 and rows <= max(row_cap, seq) and kb * head <= unroll_cap:
            best = kb
    return best if best is not None else batch   # kb == batch -> single full-array block (legal)


def _device_kind():
    try:
        return jax.devices()[0].device_kind.lower()
    except Exception:
        return ""


def _bytes(shape, dtype):
    return math.prod(shape) * jnp.dtype(dtype).itemsize


def _vmem_limit(block_bytes):
    """Scoped-VMEM limit: ~2x block footprint (double-buffering) + headroom, clamped under the
    physical VMEM of the generation (64 MiB on v7x, 128 MiB on v5e/v6e)."""
    phys = (64 << 20) if "v7" in _device_kind() else (128 << 20)
    want = 2 * block_bytes + (4 << 20)
    return int(min(max(want, 32 << 20), phys - (16 << 20)))


# ---------------------------------------------------------------------------
# Wrapper
# ---------------------------------------------------------------------------
def transformer_forward(x, params, head):
    B, S, D = x.shape
    assert D % head == 0, "input_dim must be divisible by head"
    N = B * S
    dh = D // head
    scale = 1.0 / math.sqrt(dh)
    xf = x.reshape(N, D)

    is_v7x = "v7" in _device_kind()
    gemm_cap = 256 if is_v7x else 512        # pass-1 GEMM tiles (v7x: 64 MiB VMEM budget)
    stream_cap = 512 if is_v7x else 1024     # pass-2 streaming tiles (amortize grid-step cost)

    tile_n = _largest_tile(N, gemm_cap)
    grid_n = N // tile_n
    tile_s = _largest_tile(N, stream_cap)
    grid_s = N // tile_s

    kb = _batches_per_step(B, S, head)
    grid_b = B // kb
    rows_b = kb * S

    f32, bf16 = jnp.float32, jnp.bfloat16

    # bf16 weight copies for the MXU (biases stay f32 and are added to the f32 accumulator).
    # NOTE: weights never change block index; pipeline_mode=pl.Buffered(1) could reclaim their
    # second VMEM buffer on v7x if needed.
    w_qkv = params["w_qkv"].astype(bf16)
    wo = params["wo"].astype(bf16)
    wfc = params["wfc"].astype(bf16)

    # --- 1) fused QKV + multi-head attention (no (N, 3D) HBM intermediate) -----------------
    attn_blocks = (_bytes((rows_b, D), f32) + _bytes((rows_b, D), bf16)
                   + _bytes((D, 3 * D), bf16) + _bytes((1, 3 * D), f32)
                   + _bytes((rows_b, 3 * D), f32))
    att = pl.pallas_call(
        partial(attn_kernel, head=head, d_model=D, s_len=S, kb=kb, scale=scale),
        out_shape=jax.ShapeDtypeStruct((N, D), bf16),
        grid=(grid_b,),
        in_specs=[pl.BlockSpec((rows_b, D), lambda i: (i, 0)),
                  pl.BlockSpec((D, 3 * D), lambda i: (0, 0)),
                  pl.BlockSpec((1, 3 * D), lambda i: (0, 0))],
        out_specs=pl.BlockSpec((rows_b, D), lambda i: (i, 0)),
        compiler_params=pltpu.CompilerParams(
            dimension_semantics=("parallel",),
            vmem_limit_bytes=_vmem_limit(attn_blocks)),
    )(xf, w_qkv, params["b_qkv"])

    # --- 2) pass 1: out-projection + residual-1 + FC + per-tile BN partials ("parallel") ----
    p1_blocks = (_bytes((tile_n, D), bf16) + 2 * _bytes((D, D), bf16)
                 + 2 * _bytes((1, D), f32) + 3 * _bytes((tile_n, D), f32)
                 + 2 * _bytes((1, 1, D), f32))
    y, h, psum, psq = pl.pallas_call(
        proj_fc_stats_kernel,
        out_shape=(jax.ShapeDtypeStruct((N, D), f32),
                   jax.ShapeDtypeStruct((N, D), f32),
                   jax.ShapeDtypeStruct((grid_n, 1, D), f32),
                   jax.ShapeDtypeStruct((grid_n, 1, D), f32)),
        grid=(grid_n,),
        in_specs=[pl.BlockSpec((tile_n, D), lambda i: (i, 0)),
                  pl.BlockSpec((D, D), lambda i: (0, 0)),
                  pl.BlockSpec((1, D), lambda i: (0, 0)),
                  pl.BlockSpec((tile_n, D), lambda i: (i, 0)),
                  pl.BlockSpec((D, D), lambda i: (0, 0)),
                  pl.BlockSpec((1, D), lambda i: (0, 0))],
        out_specs=(pl.BlockSpec((tile_n, D), lambda i: (i, 0)),
                   pl.BlockSpec((tile_n, D), lambda i: (i, 0)),
                   pl.BlockSpec((1, 1, D), lambda i: (i, 0, 0)),
                   pl.BlockSpec((1, 1, D), lambda i: (i, 0, 0))),
        compiler_params=pltpu.CompilerParams(
            dimension_semantics=("parallel",),
            vmem_limit_bytes=_vmem_limit(p1_blocks)),
    )(att, wo, params["bo"], xf, wfc, params["bfc"])

    # --- 3) fold BN partials + gamma/beta into per-feature scale/shift (computed once) ------
    bn_scale, bn_shift = pl.pallas_call(
        partial(bn_coeff_kernel, n_total=float(N), eps=1e-5),
        out_shape=(jax.ShapeDtypeStruct((1, D), f32),
                   jax.ShapeDtypeStruct((1, D), f32)),
    )(psum, psq, params["gamma"], params["beta"])

    # --- 4) pass 2: BN apply + ReLU + residual-2 (y aliased onto the output buffer) ---------
    out = pl.pallas_call(
        bn_relu_res_kernel,
        out_shape=jax.ShapeDtypeStruct((N, D), f32),
        grid=(grid_s,),
        in_specs=[pl.BlockSpec((tile_s, D), lambda i: (i, 0)),
                  pl.BlockSpec((tile_s, D), lambda i: (i, 0)),
                  pl.BlockSpec((1, D), lambda i: (0, 0)),
                  pl.BlockSpec((1, D), lambda i: (0, 0))],
        out_specs=pl.BlockSpec((tile_s, D), lambda i: (i, 0)),
        input_output_aliases={0: 0},
        compiler_params=pltpu.CompilerParams(
            dimension_semantics=("parallel",),
            vmem_limit_bytes=_vmem_limit(
                3 * _bytes((tile_s, D), f32) + 2 * _bytes((1, D), f32))),
    )(y, h, bn_scale, bn_shift)

    return out.reshape(B, S, D)


# ---------------------------------------------------------------------------
# Deterministic parameter init (PyTorch Linear-style uniform(-1/sqrt(fan_in), +))
# ---------------------------------------------------------------------------
def init_params(key, input_dim):
    D = input_dim
    bound = 1.0 / math.sqrt(D)
    keys = jax.random.split(key, 10)

    def u(k, shape):
        return jax.random.uniform(k, shape, jnp.float32, -bound, bound)

    wq, wk, wv = u(keys[0], (D, D)), u(keys[2], (D, D)), u(keys[4], (D, D))
    bq, bk, bv = u(keys[1], (1, D)), u(keys[3], (1, D)), u(keys[5], (1, D))
    return {
        "w_qkv": jnp.concatenate([wq, wk, wv], axis=1),   # (D, 3D) packed QKV weight
        "b_qkv": jnp.concatenate([bq, bk, bv], axis=1),   # (1, 3D) packed QKV bias
        "wo": u(keys[6], (D, D)), "bo": u(keys[7], (1, D)),
        "wfc": u(keys[8], (D, D)), "bfc": u(keys[9], (1, D)),
        "gamma": jnp.ones((1, D), jnp.float32),   # BatchNorm1d weight
        "beta": jnp.zeros((1, D), jnp.float32),   # BatchNorm1d bias
    }


# TODO(synk): BatchNorm1d running_mean/running_var (eval-mode) tracking is not implemented;
#             this kernel performs the training-mode forward with batch statistics.
# TODO(synk): for configs with D < 128 lanes (demo D=32) all stores are masked vst; padding D
#             up to 128 would need plumbing outside the module's semantics, so it is not done.

if __name__ == "__main__":
    B, S, D, HEAD = 2, 8, 32, 4          # batch=2, seq=8, input_dim=32, 4 heads
    key = jax.random.PRNGKey(0)
    k_x, k_p = jax.random.split(key)
    x = jax.random.normal(k_x, (B, S, D), jnp.float32)
    params = init_params(k_p, D)

    fwd = jax.jit(transformer_forward, static_argnums=2)
    out = fwd(x, params, HEAD)
    jax.block_until_ready(out)
    assert out.shape == (B, S, D)
    assert bool(jnp.all(jnp.isfinite(out)))
    print("KERNEL_OK")
</pallas_src>

<mosaic_0001>
module attributes {stable_mosaic.version = 11 : i64} {
  func.func @proj_fc_stats_kernel(%arg0: i32, %arg1: memref<16x32xbf16, #tpu.memory_space<vmem>>, %arg2: memref<32x32xbf16, #tpu.memory_space<vmem>>, %arg3: memref<1x32xf32, #tpu.memory_space<vmem>>, %arg4: memref<16x32xf32, #tpu.memory_space<vmem>>, %arg5: memref<32x32xbf16, #tpu.memory_space<vmem>>, %arg6: memref<1x32xf32, #tpu.memory_space<vmem>>, %arg7: memref<16x32xf32, #tpu.memory_space<vmem>>, %arg8: memref<16x32xf32, #tpu.memory_space<vmem>>, %arg9: memref<1x1x32xf32, #tpu.memory_space<vmem>>, %arg10: memref<1x1x32xf32, #tpu.memory_space<vmem>>) attributes {dimension_semantics = [#tpu.dimension_semantics<parallel>], iteration_bounds = array<i64: 1>, scalar_prefetch = 0 : i64, scratch_operands = 0 : i64, tpu.core_type = #tpu.core_type<tc>, window_params = [{transform_indices = @transform_0, window_bounds = array<i64: 16, 32>}, {pipeline_mode = #tpu.pipeline_mode<synchronous>, transform_indices = @transform_1, window_bounds = array<i64: 32, 32>}, {pipeline_mode = #tpu.pipeline_mode<synchronous>, transform_indices = @transform_2, window_bounds = array<i64: 1, 32>}, {transform_indices = @transform_3, window_bounds = array<i64: 16, 32>}, {pipeline_mode = #tpu.pipeline_mode<synchronous>, transform_indices = @transform_4, window_bounds = array<i64: 32, 32>}, {pipeline_mode = #tpu.pipeline_mode<synchronous>, transform_indices = @transform_5, window_bounds = array<i64: 1, 32>}, {transform_indices = @transform_6, window_bounds = array<i64: 16, 32>}, {transform_indices = @transform_7, window_bounds = array<i64: 16, 32>}, {transform_indices = @transform_8, window_bounds = array<i64: 1, 1, 32>}, {transform_indices = @transform_9, window_bounds = array<i64: 1, 1, 32>}]} {
    %c0 = arith.constant 0 : index
    %c0_0 = arith.constant 0 : index
    %0 = vector.load %arg1[%c0, %c0_0] : memref<16x32xbf16, #tpu.memory_space<vmem>>, vector<16x32xbf16>
    %c0_1 = arith.constant 0 : index
    %c0_2 = arith.constant 0 : index
    %1 = vector.load %arg2[%c0_1, %c0_2] : memref<32x32xbf16, #tpu.memory_space<vmem>>, vector<32x32xbf16>
    %cst = arith.constant dense<0.000000e+00> : vector<16x32xf32>
    %2 = tpu.matmul %0, %1, %cst {dimension_numbers = #tpu.dot_dimension_numbers<[1], [0], [0], [1], [0, 0, 1, 1], [], []>} : vector<16x32xbf16>, vector<32x32xbf16>, vector<16x32xf32> -> vector<16x32xf32>
    %c0_3 = arith.constant 0 : index
    %c0_4 = arith.constant 0 : index
    %3 = vector.load %arg3[%c0_3, %c0_4] : memref<1x32xf32, #tpu.memory_space<vmem>>, vector<1x32xf32>
    %4 = vector.broadcast %3 : vector<1x32xf32> to vector<16x32xf32>
    %5 = arith.addf %2, %4 : vector<16x32xf32>
    %c0_5 = arith.constant 0 : index
    %c0_6 = arith.constant 0 : index
    %6 = vector.load %arg4[%c0_5, %c0_6] : memref<16x32xf32, #tpu.memory_space<vmem>>, vector<16x32xf32>
    %7 = arith.addf %6, %5 : vector<16x32xf32>
    %8 = arith.truncf %7 : vector<16x32xf32> to vector<16x32xbf16>
    %c0_7 = arith.constant 0 : index
    %c0_8 = arith.constant 0 : index
    %9 = vector.load %arg5[%c0_7, %c0_8] : memref<32x32xbf16, #tpu.memory_space<vmem>>, vector<32x32xbf16>
    %cst_9 = arith.constant dense<0.000000e+00> : vector<16x32xf32>
    %10 = tpu.matmul %8, %9, %cst_9 {dimension_numbers = #tpu.dot_dimension_numbers<[1], [0], [0], [1], [0, 0, 1, 1], [], []>} : vector<16x32xbf16>, vector<32x32xbf16>, vector<16x32xf32> -> vector<16x32xf32>
    %c0_10 = arith.constant 0 : index
    %c0_11 = arith.constant 0 : index
    %11 = vector.load %arg6[%c0_10, %c0_11] : memref<1x32xf32, #tpu.memory_space<vmem>>, vector<1x32xf32>
    %12 = vector.broadcast %11 : vector<1x32xf32> to vector<16x32xf32>
    %13 = arith.addf %10, %12 : vector<16x32xf32>
    %c0_12 = arith.constant 0 : index
    %c0_13 = arith.constant 0 : index
    %14 = vector.load %arg7[%c0_12, %c0_13] : memref<16x32xf32, #tpu.memory_space<vmem>>, vector<16x32xf32>
    tpu.vector_store %arg7[%c0_12, %c0_13], %7 {strides = array<i32>} : memref<16x32xf32, #tpu.memory_space<vmem>>, vector<16x32xf32>,
    %c0_14 = arith.constant 0 : index
    %c0_15 = arith.constant 0 : index
    %15 = vector.load %arg8[%c0_14, %c0_15] : memref<16x32xf32, #tpu.memory_space<vmem>>, vector<16x32xf32>
    tpu.vector_store %arg8[%c0_14, %c0_15], %13 {strides = array<i32>} : memref<16x32xf32, #tpu.memory_space<vmem>>, vector<16x32xf32>,
    %cst_16 = arith.constant dense<0.000000e+00> : vector<32xf32>
    %16 = vector.multi_reduction <add>, %13, %cst_16 [0] : vector<16x32xf32> to vector<32xf32>
    %17 = vector.shape_cast %16 : vector<32xf32> to vector<1x32xf32>
    %18 = vector.shape_cast %17 : vector<1x32xf32> to vector<1x1x32xf32>
    %c0_17 = arith.constant 0 : index
    %c0_18 = arith.constant 0 : index
    %c0_19 = arith.constant 0 : index
    %19 = vector.load %arg9[%c0_17, %c0_18, %c0_19] : memref<1x1x32xf32, #tpu.memory_space<vmem>>, vector<1x1x32xf32>
    tpu.vector_store %arg9[%c0_17, %c0_18, %c0_19], %18 {strides = array<i32>} : memref<1x1x32xf32, #tpu.memory_space<vmem>>, vector<1x1x32xf32>,
    %20 = arith.mulf %13, %13 : vector<16x32xf32>
    %cst_20 = arith.constant dense<0.000000e+00> : vector<32xf32>
    %21 = vector.multi_reduction <add>, %20, %cst_20 [0] : vector<16x32xf32> to vector<32xf32>
    %22 = vector.shape_cast %21 : vector<32xf32> to vector<1x32xf32>
    %23 = vector.shape_cast %22 : vector<1x32xf32> to vector<1x1x32xf32>
    %c0_21 = arith.constant 0 : index
    %c0_22 = arith.constant 0 : index
    %c0_23 = arith.constant 0 : index
    %24 = vector.load %arg10[%c0_21, %c0_22, %c0_23] : memref<1x1x32xf32, #tpu.memory_space<vmem>>, vector<1x1x32xf32>
    tpu.vector_store %arg10[%c0_21, %c0_22, %c0_23], %23 {strides = array<i32>} : memref<1x1x32xf32, #tpu.memory_space<vmem>>, vector<1x1x32xf32>,
    return
  }
  func.func @transform_0(%arg0: i32) -> (i32, i32) {
    %c0_i32 = arith.constant 0 : i32
    %c0_i32_0 = arith.constant 0 : i32
    return %arg0, %c0_i32 : i32, i32
  }
  func.func @transform_1(%arg0: i32) -> (i32, i32) {
    %c0_i32 = arith.constant 0 : i32
    %c0_i32_0 = arith.constant 0 : i32
    %c0_i32_1 = arith.constant 0 : i32
    return %c0_i32, %c0_i32_0 : i32, i32
  }
  func.func @transform_2(%arg0: i32) -> (i32, i32) {
    %c0_i32 = arith.constant 0 : i32
    %c0_i32_0 = arith.constant 0 : i32
    %c0_i32_1 = arith.constant 0 : i32
    return %c0_i32, %c0_i32_0 : i32, i32
  }
  func.func @transform_3(%arg0: i32) -> (i32, i32) {
    %c0_i32 = arith.constant 0 : i32
    %c0_i32_0 = arith.constant 0 : i32
    return %arg0, %c0_i32 : i32, i32
  }
  func.func @transform_4(%arg0: i32) -> (i32, i32) {
    %c0_i32 = arith.constant 0 : i32
    %c0_i32_0 = arith.constant 0 : i32
    %c0_i32_1 = arith.constant 0 : i32
    return %c0_i32, %c0_i32_0 : i32, i32
  }
  func.func @transform_5(%arg0: i32) -> (i32, i32) {
    %c0_i32 = arith.constant 0 : i32
    %c0_i32_0 = arith.constant 0 : i32
    %c0_i32_1 = arith.constant 0 : i32
    return %c0_i32, %c0_i32_0 : i32, i32
  }
  func.func @transform_6(%arg0: i32) -> (i32, i32) {
    %c0_i32 = arith.constant 0 : i32
    %c0_i32_0 = arith.constant 0 : i32
    return %arg0, %c0_i32 : i32, i32
  }
  func.func @transform_7(%arg0: i32) -> (i32, i32) {
    %c0_i32 = arith.constant 0 : i32
    %c0_i32_0 = arith.constant 0 : i32
    return %arg0, %c0_i32 : i32, i32
  }
  func.func @transform_8(%arg0: i32) -> (i32, i32, i32) {
    %c0_i32 = arith.constant 0 : i32
    %c0_i32_0 = arith.constant 0 : i32
    %c0_i32_1 = arith.constant 0 : i32
    return %arg0, %c0_i32, %c0_i32_0 : i32, i32, i32
  }
  func.func @transform_9(%arg0: i32) -> (i32, i32, i32) {
    %c0_i32 = arith.constant 0 : i32
    %c0_i32_0 = arith.constant 0 : i32
    %c0_i32_1 = arith.constant 0 : i32
    return %arg0, %c0_i32, %c0_i32_0 : i32, i32, i32
  }
}

module attributes {stable_mosaic.version = 11 : i64} {
  func.func @attn_kernel(%arg0: i32, %arg1: memref<16x32xf32, #tpu.memory_space<vmem>>, %arg2: memref<32x96xbf16, #tpu.memory_space<vmem>>, %arg3: memref<1x96xf32, #tpu.memory_space<vmem>>, %arg4: memref<16x32xbf16, #tpu.memory_space<vmem>>) attributes {dimension_semantics = [#tpu.dimension_semantics<parallel>], iteration_bounds = array<i64: 1>, scalar_prefetch = 0 : i64, scratch_operands = 0 : i64, tpu.core_type = #tpu.core_type<tc>, window_params = [{transform_indices = @transform_0, window_bounds = array<i64: 16, 32>}, {pipeline_mode = #tpu.pipeline_mode<synchronous>, transform_indices = @transform_1, window_bounds = array<i64: 32, 96>}, {pipeline_mode = #tpu.pipeline_mode<synchronous>, transform_indices = @transform_2, window_bounds = array<i64: 1, 96>}, {transform_indices = @transform_3, window_bounds = array<i64: 16, 32>}]} {
    %c0 = arith.constant 0 : index
    %c0_0 = arith.constant 0 : index
    %0 = vector.load %arg1[%c0, %c0_0] : memref<16x32xf32, #tpu.memory_space<vmem>>, vector<16x32xf32>
    %1 = arith.truncf %0 : vector<16x32xf32> to vector<16x32xbf16>
    %c0_1 = arith.constant 0 : index
    %c0_2 = arith.constant 0 : index
    %2 = vector.load %arg2[%c0_1, %c0_2] : memref<32x96xbf16, #tpu.memory_space<vmem>>, vector<32x96xbf16>
    %cst = arith.constant dense<0.000000e+00> : vector<16x96xf32>
    %3 = tpu.matmul %1, %2, %cst {dimension_numbers = #tpu.dot_dimension_numbers<[1], [0], [0], [1], [0, 0, 1, 1], [], []>} : vector<16x32xbf16>, vector<32x96xbf16>, vector<16x96xf32> -> vector<16x96xf32>
    %c0_3 = arith.constant 0 : index
    %c0_4 = arith.constant 0 : index
    %4 = vector.load %arg3[%c0_3, %c0_4] : memref<1x96xf32, #tpu.memory_space<vmem>>, vector<1x96xf32>
    %5 = vector.broadcast %4 : vector<1x96xf32> to vector<16x96xf32>
    %6 = arith.addf %3, %5 : vector<16x96xf32>
    %7 = vector.extract_strided_slice %6 {offsets = [0, 0], sizes = [16, 32], strides = [1, 1]} : vector<16x96xf32> to vector<16x32xf32>
    %cst_5 = arith.constant 0.353553385 : f32
    %8 = vector.broadcast %cst_5 : f32 to vector<16x32xf32>
    %9 = arith.mulf %7, %8 : vector<16x32xf32>
    %10 = vector.extract_strided_slice %6 {offsets = [0, 32], sizes = [16, 32], strides = [1, 1]} : vector<16x96xf32> to vector<16x32xf32>
    %11 = vector.extract_strided_slice %6 {offsets = [0, 64], sizes = [16, 32], strides = [1, 1]} : vector<16x96xf32> to vector<16x32xf32>
    %12 = vector.extract_strided_slice %9 {offsets = [0, 0], sizes = [8, 8], strides = [1, 1]} : vector<16x32xf32> to vector<8x8xf32>
    %13 = arith.truncf %12 : vector<8x8xf32> to vector<8x8xbf16>
    %14 = vector.extract_strided_slice %10 {offsets = [0, 0], sizes = [8, 8], strides = [1, 1]} : vector<16x32xf32> to vector<8x8xf32>
    %15 = arith.truncf %14 : vector<8x8xf32> to vector<8x8xbf16>
    %16 = vector.extract_strided_slice %11 {offsets = [0, 0], sizes = [8, 8], strides = [1, 1]} : vector<16x32xf32> to vector<8x8xf32>
    %17 = arith.truncf %16 : vector<8x8xf32> to vector<8x8xbf16>
    %cst_6 = arith.constant dense<0.000000e+00> : vector<8x8xf32>
    %18 = tpu.matmul %13, %15, %cst_6 {dimension_numbers = #tpu.dot_dimension_numbers<[1], [1], [0], [0], [0, 0, 1, 0], [], []>} : vector<8x8xbf16>, vector<8x8xbf16>, vector<8x8xf32> -> vector<8x8xf32>
    %cst_7 = arith.constant dense<0xFF800000> : vector<8xf32>
    %19 = vector.multi_reduction <maximumf>, %18, %cst_7 [1] : vector<8x8xf32> to vector<8xf32>
    %20 = vector.shape_cast %19 : vector<8xf32> to vector<8x1xf32>
    %21 = vector.broadcast %20 : vector<8x1xf32> to vector<8x8xf32>
    %22 = arith.subf %18, %21 : vector<8x8xf32>
    %23 = math.exp %22 : vector<8x8xf32>
    %cst_8 = arith.constant dense<0.000000e+00> : vector<8xf32>
    %24 = vector.multi_reduction <add>, %23, %cst_8 [1] : vector<8x8xf32> to vector<8xf32>
    %25 = vector.shape_cast %24 : vector<8xf32> to vector<8x1xf32>
    %26 = tpu.reciprocal %25 {approx = true} : vector<8x1xf32> -> vector<8x1xf32>
    %27 = vector.broadcast %26 : vector<8x1xf32> to vector<8x8xf32>
    %28 = arith.mulf %23, %27 : vector<8x8xf32>
    %29 = arith.truncf %28 : vector<8x8xf32> to vector<8x8xbf16>
    %cst_9 = arith.constant dense<0.000000e+00> : vector<8x8xf32>
    %30 = tpu.matmul %29, %17, %cst_9 {dimension_numbers = #tpu.dot_dimension_numbers<[1], [0], [0], [1], [0, 0, 1, 1], [], []>} : vector<8x8xbf16>, vector<8x8xbf16>, vector<8x8xf32> -> vector<8x8xf32>
    %31 = arith.truncf %30 : vector<8x8xf32> to vector<8x8xbf16>
    %c0_10 = arith.constant 0 : index
    %c0_11 = arith.constant 0 : index
    %32 = vector.load %arg4[%c0_10, %c0_11] : memref<16x32xbf16, #tpu.memory_space<vmem>>, vector<8x8xbf16>
    tpu.vector_store %arg4[%c0_10, %c0_11], %31 {strides = array<i32>} : memref<16x32xbf16, #tpu.memory_space<vmem>>, vector<8x8xbf16>,
    %33 = vector.extract_strided_slice %9 {offsets = [0, 8], sizes = [8, 8], strides = [1, 1]} : vector<16x32xf32> to vector<8x8xf32>
    %34 = arith.truncf %33 : vector<8x8xf32> to vector<8x8xbf16>
    %35 = vector.extract_strided_slice %10 {offsets = [0, 8], sizes = [8, 8], strides = [1, 1]} : vector<16x32xf32> to vector<8x8xf32>
    %36 = arith.truncf %35 : vector<8x8xf32> to vector<8x8xbf16>
    %37 = vector.extract_strided_slice %11 {offsets = [0, 8], sizes = [8, 8], strides = [1, 1]} : vector<16x32xf32> to vector<8x8xf32>
    %38 = arith.truncf %37 : vector<8x8xf32> to vector<8x8xbf16>
    %cst_12 = arith.constant dense<0.000000e+00> : vector<8x8xf32>
    %39 = tpu.matmul %34, %36, %cst_12 {dimension_numbers = #tpu.dot_dimension_numbers<[1], [1], [0], [0], [0, 0, 1, 0], [], []>} : vector<8x8xbf16>, vector<8x8xbf16>, vector<8x8xf32> -> vector<8x8xf32>
    %cst_13 = arith.constant dense<0xFF800000> : vector<8xf32>
    %40 = vector.multi_reduction <maximumf>, %39, %cst_13 [1] : vector<8x8xf32> to vector<8xf32>
    %41 = vector.shape_cast %40 : vector<8xf32> to vector<8x1xf32>
    %42 = vector.broadcast %41 : vector<8x1xf32> to vector<8x8xf32>
    %43 = arith.subf %39, %42 : vector<8x8xf32>
    %44 = math.exp %43 : vector<8x8xf32>
    %cst_14 = arith.constant dense<0.000000e+00> : vector<8xf32>
    %45 = vector.multi_reduction <add>, %44, %cst_14 [1] : vector<8x8xf32> to vector<8xf32>
    %46 = vector.shape_cast %45 : vector<8xf32> to vector<8x1xf32>
    %47 = tpu.reciprocal %46 {approx = true} : vector<8x1xf32> -> vector<8x1xf32>
    %48 = vector.broadcast %47 : vector<8x1xf32> to vector<8x8xf32>
    %49 = arith.mulf %44, %48 : vector<8x8xf32>
    %50 = arith.truncf %49 : vector<8x8xf32> to vector<8x8xbf16>
    %cst_15 = arith.constant dense<0.000000e+00> : vector<8x8xf32>
    %51 = tpu.matmul %50, %38, %cst_15 {dimension_numbers = #tpu.dot_dimension_numbers<[1], [0], [0], [1], [0, 0, 1, 1], [], []>} : vector<8x8xbf16>, vector<8x8xbf16>, vector<8x8xf32> -> vector<8x8xf32>
    %52 = arith.truncf %51 : vector<8x8xf32> to vector<8x8xbf16>
    %c0_16 = arith.constant 0 : index
    %c8 = arith.constant 8 : index
    %53 = vector.load %arg4[%c0_16, %c8] : memref<16x32xbf16, #tpu.memory_space<vmem>>, vector<8x8xbf16>
    tpu.vector_store %arg4[%c0_16, %c8], %52 {strides = array<i32>} : memref<16x32xbf16, #tpu.memory_space<vmem>>, vector<8x8xbf16>,
    %54 = vector.extract_strided_slice %9 {offsets = [0, 16], sizes = [8, 8], strides = [1, 1]} : vector<16x32xf32> to vector<8x8xf32>
    %55 = arith.truncf %54 : vector<8x8xf32> to vector<8x8xbf16>
    %56 = vector.extract_strided_slice %10 {offsets = [0, 16], sizes = [8, 8], strides = [1, 1]} : vector<16x32xf32> to vector<8x8xf32>
    %57 = arith.truncf %56 : vector<8x8xf32> to vector<8x8xbf16>
    %58 = vector.extract_strided_slice %11 {offsets = [0, 16], sizes = [8, 8], strides = [1, 1]} : vector<16x32xf32> to vector<8x8xf32>
    %59 = arith.truncf %58 : vector<8x8xf32> to vector<8x8xbf16>
    %cst_17 = arith.constant dense<0.000000e+00> : vector<8x8xf32>
    %60 = tpu.matmul %55, %57, %cst_17 {dimension_numbers = #tpu.dot_dimension_numbers<[1], [1], [0], [0], [0, 0, 1, 0], [], []>} : vector<8x8xbf16>, vector<8x8xbf16>, vector<8x8xf32> -> vector<8x8xf32>
    %cst_18 = arith.constant dense<0xFF800000> : vector<8xf32>
    %61 = vector.multi_reduction <maximumf>, %60, %cst_18 [1] : vector<8x8xf32> to vector<8xf32>
    %62 = vector.shape_cast %61 : vector<8xf32> to vector<8x1xf32>
    %63 = vector.broadcast %62 : vector<8x1xf32> to vector<8x8xf32>
    %64 = arith.subf %60, %63 : vector<8x8xf32>
    %65 = math.exp %64 : vector<8x8xf32>
    %cst_19 = arith.constant dense<0.000000e+00> : vector<8xf32>
    %66 = vector.multi_reduction <add>, %65, %cst_19 [1] : vector<8x8xf32> to vector<8xf32>
    %67 = vector.shape_cast %66 : vector<8xf32> to vector<8x1xf32>
    %68 = tpu.reciprocal %67 {approx = true} : vector<8x1xf32> -> vector<8x1xf32>
    %69 = vector.broadcast %68 : vector<8x1xf32> to vector<8x8xf32>
    %70 = arith.mulf %65, %69 : vector<8x8xf32>
    %71 = arith.truncf %70 : vector<8x8xf32> to vector<8x8xbf16>
    %cst_20 = arith.constant dense<0.000000e+00> : vector<8x8xf32>
    %72 = tpu.matmul %71, %59, %cst_20 {dimension_numbers = #tpu.dot_dimension_numbers<[1], [0], [0], [1], [0, 0, 1, 1], [], []>} : vector<8x8xbf16>, vector<8x8xbf16>, vector<8x8xf32> -> vector<8x8xf32>
    %73 = arith.truncf %72 : vector<8x8xf32> to vector<8x8xbf16>
    %c0_21 = arith.constant 0 : index
    %c16 = arith.constant 16 : index
    %74 = vector.load %arg4[%c0_21, %c16] : memref<16x32xbf16, #tpu.memory_space<vmem>>, vector<8x8xbf16>
    tpu.vector_store %arg4[%c0_21, %c16], %73 {strides = array<i32>} : memref<16x32xbf16, #tpu.memory_space<vmem>>, vector<8x8xbf16>,
    %75 = vector.extract_strided_slice %9 {offsets = [0, 24], sizes = [8, 8], strides = [1, 1]} : vector<16x32xf32> to vector<8x8xf32>
    %76 = arith.truncf %75 : vector<8x8xf32> to vector<8x8xbf16>
    %77 = vector.extract_strided_slice %10 {offsets = [0, 24], sizes = [8, 8], strides = [1, 1]} : vector<16x32xf32> to vector<8x8xf32>
    %78 = arith.truncf %77 : vector<8x8xf32> to vector<8x8xbf16>
    %79 = vector.extract_strided_slice %11 {offsets = [0, 24], sizes = [8, 8], strides = [1, 1]} : vector<16x32xf32> to vector<8x8xf32>
    %80 = arith.truncf %79 : vector<8x8xf32> to vector<8x8xbf16>
    %cst_22 = arith.constant dense<0.000000e+00> : vector<8x8xf32>
    %81 = tpu.matmul %76, %78, %cst_22 {dimension_numbers = #tpu.dot_dimension_numbers<[1], [1], [0], [0], [0, 0, 1, 0], [], []>} : vector<8x8xbf16>, vector<8x8xbf16>, vector<8x8xf32> -> vector<8x8xf32>
    %cst_23 = arith.constant dense<0xFF800000> : vector<8xf32>
    %82 = vector.multi_reduction <maximumf>, %81, %cst_23 [1] : vector<8x8xf32> to vector<8xf32>
    %83 = vector.shape_cast %82 : vector<8xf32> to vector<8x1xf32>
    %84 = vector.broadcast %83 : vector<8x1xf32> to vector<8x8xf32>
    %85 = arith.subf %81, %84 : vector<8x8xf32>
    %86 = math.exp %85 : vector<8x8xf32>
    %cst_24 = arith.constant dense<0.000000e+00> : vector<8xf32>
    %87 = vector.multi_reduction <add>, %86, %cst_24 [1] : vector<8x8xf32> to vector<8xf32>
    %88 = vector.shape_cast %87 : vector<8xf32> to vector<8x1xf32>
    %89 = tpu.reciprocal %88 {approx = true} : vector<8x1xf32> -> vector<8x1xf32>
    %90 = vector.broadcast %89 : vector<8x1xf32> to vector<8x8xf32>
    %91 = arith.mulf %86, %90 : vector<8x8xf32>
    %92 = arith.truncf %91 : vector<8x8xf32> to vector<8x8xbf16>
    %cst_25 = arith.constant dense<0.000000e+00> : vector<8x8xf32>
    %93 = tpu.matmul %92, %80, %cst_25 {dimension_numbers = #tpu.dot_dimension_numbers<[1], [0], [0], [1], [0, 0, 1, 1], [], []>} : vector<8x8xbf16>, vector<8x8xbf16>, vector<8x8xf32> -> vector<8x8xf32>
    %94 = arith.truncf %93 : vector<8x8xf32> to vector<8x8xbf16>
    %c0_26 = arith.constant 0 : index
    %c24 = arith.constant 24 : index
    %95 = vector.load %arg4[%c0_26, %c24] : memref<16x32xbf16, #tpu.memory_space<vmem>>, vector<8x8xbf16>
    tpu.vector_store %arg4[%c0_26, %c24], %94 {strides = array<i32>} : memref<16x32xbf16, #tpu.memory_space<vmem>>, vector<8x8xbf16>,
    %96 = vector.extract_strided_slice %9 {offsets = [8, 0], sizes = [8, 8], strides = [1, 1]} : vector<16x32xf32> to vector<8x8xf32>
    %97 = arith.truncf %96 : vector<8x8xf32> to vector<8x8xbf16>
    %98 = vector.extract_strided_slice %10 {offsets = [8, 0], sizes = [8, 8], strides = [1, 1]} : vector<16x32xf32> to vector<8x8xf32>
    %99 = arith.truncf %98 : vector<8x8xf32> to vector<8x8xbf16>
    %100 = vector.extract_strided_slice %11 {offsets = [8, 0], sizes = [8, 8], strides = [1, 1]} : vector<16x32xf32> to vector<8x8xf32>
    %101 = arith.truncf %100 : vector<8x8xf32> to vector<8x8xbf16>
    %cst_27 = arith.constant dense<0.000000e+00> : vector<8x8xf32>
    %102 = tpu.matmul %97, %99, %cst_27 {dimension_numbers = #tpu.dot_dimension_numbers<[1], [1], [0], [0], [0, 0, 1, 0], [], []>} : vector<8x8xbf16>, vector<8x8xbf16>, vector<8x8xf32> -> vector<8x8xf32>
    %cst_28 = arith.constant dense<0xFF800000> : vector<8xf32>
    %103 = vector.multi_reduction <maximumf>, %102, %cst_28 [1] : vector<8x8xf32> to vector<8xf32>
    %104 = vector.shape_cast %103 : vector<8xf32> to vector<8x1xf32>
    %105 = vector.broadcast %104 : vector<8x1xf32> to vector<8x8xf32>
    %106 = arith.subf %102, %105 : vector<8x8xf32>
    %107 = math.exp %106 : vector<8x8xf32>
    %cst_29 = arith.constant dense<0.000000e+00> : vector<8xf32>
    %108 = vector.multi_reduction <add>, %107, %cst_29 [1] : vector<8x8xf32> to vector<8xf32>
    %109 = vector.shape_cast %108 : vector<8xf32> to vector<8x1xf32>
    %110 = tpu.reciprocal %109 {approx = true} : vector<8x1xf32> -> vector<8x1xf32>
    %111 = vector.broadcast %110 : vector<8x1xf32> to vector<8x8xf32>
    %112 = arith.mulf %107, %111 : vector<8x8xf32>
    %113 = arith.truncf %112 : vector<8x8xf32> to vector<8x8xbf16>
    %cst_30 = arith.constant dense<0.000000e+00> : vector<8x8xf32>
    %114 = tpu.matmul %113, %101, %cst_30 {dimension_numbers = #tpu.dot_dimension_numbers<[1], [0], [0], [1], [0, 0, 1, 1], [], []>} : vector<8x8xbf16>, vector<8x8xbf16>, vector<8x8xf32> -> vector<8x8xf32>
    %115 = arith.truncf %114 : vector<8x8xf32> to vector<8x8xbf16>
    %c8_31 = arith.constant 8 : index
    %c0_32 = arith.constant 0 : index
    %116 = vector.load %arg4[%c8_31, %c0_32] : memref<16x32xbf16, #tpu.memory_space<vmem>>, vector<8x8xbf16>
    tpu.vector_store %arg4[%c8_31, %c0_32], %115 {strides = array<i32>} : memref<16x32xbf16, #tpu.memory_space<vmem>>, vector<8x8xbf16>,
    %117 = vector.extract_strided_slice %9 {offsets = [8, 8], sizes = [8, 8], strides = [1, 1]} : vector<16x32xf32> to vector<8x8xf32>
    %118 = arith.truncf %117 : vector<8x8xf32> to vector<8x8xbf16>
    %119 = vector.extract_strided_slice %10 {offsets = [8, 8], sizes = [8, 8], strides = [1, 1]} : vector<16x32xf32> to vector<8x8xf32>
    %120 = arith.truncf %119 : vector<8x8xf32> to vector<8x8xbf16>
    %121 = vector.extract_strided_slice %11 {offsets = [8, 8], sizes = [8, 8], strides = [1, 1]} : vector<16x32xf32> to vector<8x8xf32>
    %122 = arith.truncf %121 : vector<8x8xf32> to vector<8x8xbf16>
    %cst_33 = arith.constant dense<0.000000e+00> : vector<8x8xf32>
    %123 = tpu.matmul %118, %120, %cst_33 {dimension_numbers = #tpu.dot_dimension_numbers<[1], [1], [0], [0], [0, 0, 1, 0], [], []>} : vector<8x8xbf16>, vector<8x8xbf16>, vector<8x8xf32> -> vector<8x8xf32>
    %cst_34 = arith.constant dense<0xFF800000> : vector<8xf32>
    %124 = vector.multi_reduction <maximumf>, %123, %cst_34 [1] : vector<8x8xf32> to vector<8xf32>
    %125 = vector.shape_cast %124 : vector<8xf32> to vector<8x1xf32>
    %126 = vector.broadcast %125 : vector<8x1xf32> to vector<8x8xf32>
    %127 = arith.subf %123, %126 : vector<8x8xf32>
    %128 = math.exp %127 : vector<8x8xf32>
    %cst_35 = arith.constant dense<0.000000e+00> : vector<8xf32>
    %129 = vector.multi_reduction <add>, %128, %cst_35 [1] : vector<8x8xf32> to vector<8xf32>
    %130 = vector.shape_cast %129 : vector<8xf32> to vector<8x1xf32>
    %131 = tpu.reciprocal %130 {approx = true} : vector<8x1xf32> -> vector<8x1xf32>
    %132 = vector.broadcast %131 : vector<8x1xf32> to vector<8x8xf32>
    %133 = arith.mulf %128, %132 : vector<8x8xf32>
    %134 = arith.truncf %133 : vector<8x8xf32> to vector<8x8xbf16>
    %cst_36 = arith.constant dense<0.000000e+00> : vector<8x8xf32>
    %135 = tpu.matmul %134, %122, %cst_36 {dimension_numbers = #tpu.dot_dimension_numbers<[1], [0], [0], [1], [0, 0, 1, 1], [], []>} : vector<8x8xbf16>, vector<8x8xbf16>, vector<8x8xf32> -> vector<8x8xf32>
    %136 = arith.truncf %135 : vector<8x8xf32> to vector<8x8xbf16>
    %c8_37 = arith.constant 8 : index
    %c8_38 = arith.constant 8 : index
    %137 = vector.load %arg4[%c8_37, %c8_38] : memref<16x32xbf16, #tpu.memory_space<vmem>>, vector<8x8xbf16>
    tpu.vector_store %arg4[%c8_37, %c8_38], %136 {strides = array<i32>} : memref<16x32xbf16, #tpu.memory_space<vmem>>, vector<8x8xbf16>,
    %138 = vector.extract_strided_slice %9 {offsets = [8, 16], sizes = [8, 8], strides = [1, 1]} : vector<16x32xf32> to vector<8x8xf32>
    %139 = arith.truncf %138 : vector<8x8xf32> to vector<8x8xbf16>
    %140 = vector.extract_strided_slice %10 {offsets = [8, 16], sizes = [8, 8], strides = [1, 1]} : vector<16x32xf32> to vector<8x8xf32>
    %141 = arith.truncf %140 : vector<8x8xf32> to vector<8x8xbf16>
    %142 = vector.extract_strided_slice %11 {offsets = [8, 16], sizes = [8, 8], strides = [1, 1]} : vector<16x32xf32> to vector<8x8xf32>
    %143 = arith.truncf %142 : vector<8x8xf32> to vector<8x8xbf16>
    %cst_39 = arith.constant dense<0.000000e+00> : vector<8x8xf32>
    %144 = tpu.matmul %139, %141, %cst_39 {dimension_numbers = #tpu.dot_dimension_numbers<[1], [1], [0], [0], [0, 0, 1, 0], [], []>} : vector<8x8xbf16>, vector<8x8xbf16>, vector<8x8xf32> -> vector<8x8xf32>
    %cst_40 = arith.constant dense<0xFF800000> : vector<8xf32>
    %145 = vector.multi_reduction <maximumf>, %144, %cst_40 [1] : vector<8x8xf32> to vector<8xf32>
    %146 = vector.shape_cast %145 : vector<8xf32> to vector<8x1xf32>
    %147 = vector.broadcast %146 : vector<8x1xf32> to vector<8x8xf32>
    %148 = arith.subf %144, %147 : vector<8x8xf32>
    %149 = math.exp %148 : vector<8x8xf32>
    %cst_41 = arith.constant dense<0.000000e+00> : vector<8xf32>
    %150 = vector.multi_reduction <add>, %149, %cst_41 [1] : vector<8x8xf32> to vector<8xf32>
    %151 = vector.shape_cast %150 : vector<8xf32> to vector<8x1xf32>
    %152 = tpu.reciprocal %151 {approx = true} : vector<8x1xf32> -> vector<8x1xf32>
    %153 = vector.broadcast %152 : vector<8x1xf32> to vector<8x8xf32>
    %154 = arith.mulf %149, %153 : vector<8x8xf32>
    %155 = arith.truncf %154 : vector<8x8xf32> to vector<8x8xbf16>
    %cst_42 = arith.constant dense<0.000000e+00> : vector<8x8xf32>
    %156 = tpu.matmul %155, %143, %cst_42 {dimension_numbers = #tpu.dot_dimension_numbers<[1], [0], [0], [1], [0, 0, 1, 1], [], []>} : vector<8x8xbf16>, vector<8x8xbf16>, vector<8x8xf32> -> vector<8x8xf32>
    %157 = arith.truncf %156 : vector<8x8xf32> to vector<8x8xbf16>
    %c8_43 = arith.constant 8 : index
    %c16_44 = arith.constant 16 : index
    %158 = vector.load %arg4[%c8_43, %c16_44] : memref<16x32xbf16, #tpu.memory_space<vmem>>, vector<8x8xbf16>
    tpu.vector_store %arg4[%c8_43, %c16_44], %157 {strides = array<i32>} : memref<16x32xbf16, #tpu.memory_space<vmem>>, vector<8x8xbf16>,
    %159 = vector.extract_strided_slice %9 {offsets = [8, 24], sizes = [8, 8], strides = [1, 1]} : vector<16x32xf32> to vector<8x8xf32>
    %160 = arith.truncf %159 : vector<8x8xf32> to vector<8x8xbf16>
    %161 = vector.extract_strided_slice %10 {offsets = [8, 24], sizes = [8, 8], strides = [1, 1]} : vector<16x32xf32> to vector<8x8xf32>
    %162 = arith.truncf %161 : vector<8x8xf32> to vector<8x8xbf16>
    %163 = vector.extract_strided_slice %11 {offsets = [8, 24], sizes = [8, 8], strides = [1, 1]} : vector<16x32xf32> to vector<8x8xf32>
    %164 = arith.truncf %163 : vector<8x8xf32> to vector<8x8xbf16>
    %cst_45 = arith.constant dense<0.000000e+00> : vector<8x8xf32>
    %165 = tpu.matmul %160, %162, %cst_45 {dimension_numbers = #tpu.dot_dimension_numbers<[1], [1], [0], [0], [0, 0, 1, 0], [], []>} : vector<8x8xbf16>, vector<8x8xbf16>, vector<8x8xf32> -> vector<8x8xf32>
    %cst_46 = arith.constant dense<0xFF800000> : vector<8xf32>
    %166 = vector.multi_reduction <maximumf>, %165, %cst_46 [1] : vector<8x8xf32> to vector<8xf32>
    %167 = vector.shape_cast %166 : vector<8xf32> to vector<8x1xf32>
    %168 = vector.broadcast %167 : vector<8x1xf32> to vector<8x8xf32>
    %169 = arith.subf %165, %168 : vector<8x8xf32>
    %170 = math.exp %169 : vector<8x8xf32>
    %cst_47 = arith.constant dense<0.000000e+00> : vector<8xf32>
    %171 = vector.multi_reduction <add>, %170, %cst_47 [1] : vector<8x8xf32> to vector<8xf32>
    %172 = vector.shape_cast %171 : vector<8xf32> to vector<8x1xf32>
    %173 = tpu.reciprocal %172 {approx = true} : vector<8x1xf32> -> vector<8x1xf32>
    %174 = vector.broadcast %173 : vector<8x1xf32> to vector<8x8xf32>
    %175 = arith.mulf %170, %174 : vector<8x8xf32>
    %176 = arith.truncf %175 : vector<8x8xf32> to vector<8x8xbf16>
    %cst_48 = arith.constant dense<0.000000e+00> : vector<8x8xf32>
    %177 = tpu.matmul %176, %164, %cst_48 {dimension_numbers = #tpu.dot_dimension_numbers<[1], [0], [0], [1], [0, 0, 1, 1], [], []>} : vector<8x8xbf16>, vector<8x8xbf16>, vector<8x8xf32> -> vector<8x8xf32>
    %178 = arith.truncf %177 : vector<8x8xf32> to vector<8x8xbf16>
    %c8_49 = arith.constant 8 : index
    %c24_50 = arith.constant 24 : index
    %179 = vector.load %arg4[%c8_49, %c24_50] : memref<16x32xbf16, #tpu.memory_space<vmem>>, vector<8x8xbf16>
    tpu.vector_store %arg4[%c8_49, %c24_50], %178 {strides = array<i32>} : memref<16x32xbf16, #tpu.memory_space<vmem>>, vector<8x8xbf16>,
    return
  }
  func.func @transform_0(%arg0: i32) -> (i32, i32) {
    %c0_i32 = arith.constant 0 : i32
    %c0_i32_0 = arith.constant 0 : i32
    return %arg0, %c0_i32 : i32, i32
  }
  func.func @transform_1(%arg0: i32) -> (i32, i32) {
    %c0_i32 = arith.constant 0 : i32
    %c0_i32_0 = arith.constant 0 : i32
    %c0_i32_1 = arith.constant 0 : i32
    return %c0_i32, %c0_i32_0 : i32, i32
  }
  func.func @transform_2(%arg0: i32) -> (i32, i32) {
    %c0_i32 = arith.constant 0 : i32
    %c0_i32_0 = arith.constant 0 : i32
    %c0_i32_1 = arith.constant 0 : i32
    return %c0_i32, %c0_i32_0 : i32, i32
  }
  func.func @transform_3(%arg0: i32) -> (i32, i32) {
    %c0_i32 = arith.constant 0 : i32
    %c0_i32_0 = arith.constant 0 : i32
    return %arg0, %c0_i32 : i32, i32
  }
}

module attributes {stable_mosaic.version = 11 : i64} {
  func.func @bn_coeff_kernel(%arg0: memref<1x1x32xf32, #tpu.memory_space<vmem>>, %arg1: memref<1x1x32xf32, #tpu.memory_space<vmem>>, %arg2: memref<1x32xf32, #tpu.memory_space<vmem>>, %arg3: memref<1x32xf32, #tpu.memory_space<vmem>>, %arg4: memref<1x32xf32, #tpu.memory_space<vmem>>, %arg5: memref<1x32xf32, #tpu.memory_space<vmem>>) attributes {dimension_semantics = [], scalar_prefetch = 0 : i64, scratch_operands = 0 : i64, tpu.core_type = #tpu.core_type<tc>} {
    %c0 = arith.constant 0 : index
    %c0_0 = arith.constant 0 : index
    %c0_1 = arith.constant 0 : index
    %0 = vector.load %arg0[%c0, %c0_0, %c0_1] : memref<1x1x32xf32, #tpu.memory_space<vmem>>, vector<1x1x32xf32>
    %cst = arith.constant dense<0.000000e+00> : vector<1x32xf32>
    %1 = vector.multi_reduction <add>, %0, %cst [0] : vector<1x1x32xf32> to vector<1x32xf32>
    %cst_2 = arith.constant 6.250000e-02 : f32
    %2 = vector.broadcast %cst_2 : f32 to vector<1x32xf32>
    %3 = arith.mulf %1, %2 : vector<1x32xf32>
    %c0_3 = arith.constant 0 : index
    %c0_4 = arith.constant 0 : index
    %c0_5 = arith.constant 0 : index
    %4 = vector.load %arg1[%c0_3, %c0_4, %c0_5] : memref<1x1x32xf32, #tpu.memory_space<vmem>>, vector<1x1x32xf32>
    %cst_6 = arith.constant dense<0.000000e+00> : vector<1x32xf32>
    %5 = vector.multi_reduction <add>, %4, %cst_6 [0] : vector<1x1x32xf32> to vector<1x32xf32>
    %cst_7 = arith.constant 6.250000e-02 : f32
    %6 = vector.broadcast %cst_7 : f32 to vector<1x32xf32>
    %7 = arith.mulf %5, %6 : vector<1x32xf32>
    %8 = arith.mulf %3, %3 : vector<1x32xf32>
    %9 = arith.subf %7, %8 : vector<1x32xf32>
    %cst_8 = arith.constant 0.000000e+00 : f32
    %10 = vector.broadcast %cst_8 : f32 to vector<1x32xf32>
    %11 = arith.maximumf %9, %10 : vector<1x32xf32>
    %cst_9 = arith.constant 9.99999974E-6 : f32
    %12 = vector.broadcast %cst_9 : f32 to vector<1x32xf32>
    %13 = arith.addf %11, %12 : vector<1x32xf32>
    %14 = math.rsqrt %13 : vector<1x32xf32>
    %c0_10 = arith.constant 0 : index
    %c0_11 = arith.constant 0 : index
    %15 = vector.load %arg2[%c0_10, %c0_11] : memref<1x32xf32, #tpu.memory_space<vmem>>, vector<1x32xf32>
    %16 = arith.mulf %15, %14 : vector<1x32xf32>
    %c0_12 = arith.constant 0 : index
    %c0_13 = arith.constant 0 : index
    %17 = vector.load %arg4[%c0_12, %c0_13] : memref<1x32xf32, #tpu.memory_space<vmem>>, vector<1x32xf32>
    tpu.vector_store %arg4[%c0_12, %c0_13], %16 {strides = array<i32>} : memref<1x32xf32, #tpu.memory_space<vmem>>, vector<1x32xf32>,
    %c0_14 = arith.constant 0 : index
    %c0_15 = arith.constant 0 : index
    %18 = vector.load %arg3[%c0_14, %c0_15] : memref<1x32xf32, #tpu.memory_space<vmem>>, vector<1x32xf32>
    %19 = arith.mulf %3, %16 : vector<1x32xf32>
    %20 = arith.subf %18, %19 : vector<1x32xf32>
    %c0_16 = arith.constant 0 : index
    %c0_17 = arith.constant 0 : index
    %21 = vector.load %arg5[%c0_16, %c0_17] : memref<1x32xf32, #tpu.memory_space<vmem>>, vector<1x32xf32>
    tpu.vector_store %arg5[%c0_16, %c0_17], %20 {strides = array<i32>} : memref<1x32xf32, #tpu.memory_space<vmem>>, vector<1x32xf32>,
    return
  }
}

module attributes {stable_mosaic.version = 11 : i64} {
  func.func @bn_relu_res_kernel(%arg0: i32, %arg1: memref<16x32xf32, #tpu.memory_space<vmem>>, %arg2: memref<16x32xf32, #tpu.memory_space<vmem>>, %arg3: memref<1x32xf32, #tpu.memory_space<vmem>>, %arg4: memref<1x32xf32, #tpu.memory_space<vmem>>, %arg5: memref<16x32xf32, #tpu.memory_space<vmem>>) attributes {dimension_semantics = [#tpu.dimension_semantics<parallel>], iteration_bounds = array<i64: 1>, scalar_prefetch = 0 : i64, scratch_operands = 0 : i64, tpu.core_type = #tpu.core_type<tc>, window_params = [{transform_indices = @transform_0, window_bounds = array<i64: 16, 32>}, {transform_indices = @transform_1, window_bounds = array<i64: 16, 32>}, {pipeline_mode = #tpu.pipeline_mode<synchronous>, transform_indices = @transform_2, window_bounds = array<i64: 1, 32>}, {pipeline_mode = #tpu.pipeline_mode<synchronous>, transform_indices = @transform_3, window_bounds = array<i64: 1, 32>}, {transform_indices = @transform_4, window_bounds = array<i64: 16, 32>}]} {
    %c0 = arith.constant 0 : index
    %c0_0 = arith.constant 0 : index
    %0 = vector.load %arg2[%c0, %c0_0] : memref<16x32xf32, #tpu.memory_space<vmem>>, vector<16x32xf32>
    %c0_1 = arith.constant 0 : index
    %c0_2 = arith.constant 0 : index
    %1 = vector.load %arg3[%c0_1, %c0_2] : memref<1x32xf32, #tpu.memory_space<vmem>>, vector<1x32xf32>
    %2 = vector.broadcast %1 : vector<1x32xf32> to vector<16x32xf32>
    %3 = arith.mulf %0, %2 : vector<16x32xf32>
    %c0_3 = arith.constant 0 : index
    %c0_4 = arith.constant 0 : index
    %4 = vector.load %arg4[%c0_3, %c0_4] : memref<1x32xf32, #tpu.memory_space<vmem>>, vector<1x32xf32>
    %5 = vector.broadcast %4 : vector<1x32xf32> to vector<16x32xf32>
    %6 = arith.addf %3, %5 : vector<16x32xf32>
    %cst = arith.constant 0.000000e+00 : f32
    %7 = vector.broadcast %cst : f32 to vector<16x32xf32>
    %8 = arith.maximumf %6, %7 : vector<16x32xf32>
    %c0_5 = arith.constant 0 : index
    %c0_6 = arith.constant 0 : index
    %9 = vector.load %arg1[%c0_5, %c0_6] : memref<16x32xf32, #tpu.memory_space<vmem>>, vector<16x32xf32>
    %10 = arith.addf %9, %8 : vector<16x32xf32>
    %c0_7 = arith.constant 0 : index
    %c0_8 = arith.constant 0 : index
    %11 = vector.load %arg5[%c0_7, %c0_8] : memref<16x32xf32, #tpu.memory_space<vmem>>, vector<16x32xf32>
    tpu.vector_store %arg5[%c0_7, %c0_8], %10 {strides = array<i32>} : memref<16x32xf32, #tpu.memory_space<vmem>>, vector<16x32xf32>,
    return
  }
  func.func @transform_0(%arg0: i32) -> (i32, i32) {
    %c0_i32 = arith.constant 0 : i32
    %c0_i32_0 = arith.constant 0 : i32
    return %arg0, %c0_i32 : i32, i32
  }
  func.func @transform_1(%arg0: i32) -> (i32, i32) {
    %c0_i32 = arith.constant 0 : i32
    %c0_i32_0 = arith.constant 0 : i32
    return %arg0, %c0_i32 : i32, i32
  }
  func.func @transform_2(%arg0: i32) -> (i32, i32) {
    %c0_i32 = arith.constant 0 : i32
    %c0_i32_0 = arith.constant 0 : i32
    %c0_i32_1 = arith.constant 0 : i32
    return %c0_i32, %c0_i32_0 : i32, i32
  }
  func.func @transform_3(%arg0: i32) -> (i32, i32) {
    %c0_i32 = arith.constant 0 : i32
    %c0_i32_0 = arith.constant 0 : i32
    %c0_i32_1 = arith.constant 0 : i32
    return %c0_i32, %c0_i32_0 : i32, i32
  }
  func.func @transform_4(%arg0: i32) -> (i32, i32) {
    %c0_i32 = arith.constant 0 : i32
    %c0_i32_0 = arith.constant 0 : i32
    return %arg0, %c0_i32 : i32, i32
  }
}

</mosaic_0001>

<bundles_post_ra>
// kernel: transformer_forward.6
= control target key start
LH: loop header
LB: loop body
LE: loop exit
PB: predicated region body
PF: predicated region fallthrough
CT: control target
= control target key end

     0   :  { %vm32_vm0 = vcmask 253952   ;;  %s96_s0 = inlined_call_operand.vmem [shape: f32[1,1,32], index: 0, kind: input, shape index: {}]   ;;  %s97_s1 = inlined_call_operand.vmem [shape: f32[1,1,32], index: 1, kind: input, shape index: {}]   ;;  %s98_s2 = inlined_call_operand.vmem [shape: f32[1,32], index: 2, kind: input, shape index: {}]   ;;  %s99_s3 = inlined_call_operand.vmem [shape: f32[1,32], index: 3, kind: input, shape index: {}]   ;;  %s100_s4 = inlined_call_operand.vmem [shape: f32[1,32], index: 4, kind: output, shape index: {0}]   ;;  %s101_s5 = inlined_call_operand.vmem [shape: f32[1,32], index: 5, kind: output, shape index: {1}]  }
   0x1   :  { %v19_v0 = vld [vmem:[%s96_s0] sm:$0x1] }
   0x2   :  { %v22_v1 = vld [vmem:[%s97_s1] sm:$0x1]  ;;  %v21_v2 = vmul.f32 0.0625, %v19_v0 }
   0x3   :  { %v24_v3 = vmul.f32 0.0625, %v22_v1  ;;  %v30_v8 = vld [vmem:[%s98_s2] sm:$0x1] }
   0x4   :  { %v25_v4 = vmul.f32 %v21_v2, %v21_v2  ;;  %v34_v11 = vld [vmem:[%s99_s3] sm:$0x1] }
   0x6   :  { %v26_v5 = vsub.f32 %v24_v3, %v25_v4 }
   0x8   :  { %v27_v6 = vmax.f32 %v26_v5, 0.0 }
   0xa   :  { %v28_v7 = vadd.f32 1e-05, %v27_v6 }
   0xc   :  { %46 = vrsqrt.f32 %v28_v7 }
  0x16   :  { %v47_v9 = vpop.eup %46 }
  0x17   :  { %v31_v10 = vmul.f32 %v47_v9, %v30_v8 }
  0x19   :  { %33 = vst.msk [vmem:[%s100_s4] sm:$0x1] %vm32_vm0, %v31_v10  ;;  %v35_v12 = vmul.f32 %v31_v10, %v21_v2 }
  0x1b   :  { %v36_v13 = vsub.f32 %v34_v11, %v35_v12 }
  0x1d   :  { %37 = vst.msk [vmem:[%s101_s5] sm:$0x1] %vm32_vm0, %v36_v13 }

// kernel: transformer_forward.7
= control target key start
LH: loop header
LB: loop body
LE: loop exit
PB: predicated region body
PF: predicated region fallthrough
CT: control target
= control target key end

     0   :  { %vm43_vm0 = vcmask 261120   ;;  %s101_s1 = inlined_call_operand.vmem [shape: f32[16,32], index: 1, kind: input, shape index: {}]   ;;  %s102_s2 = inlined_call_operand.vmem [shape: f32[1,32], index: 2, kind: input, shape index: {}]   ;;  %s103_s3 = inlined_call_operand.vmem [shape: f32[1,32], index: 3, kind: input, shape index: {}]   ;;  %s104_s0 = inlined_call_operand.vmem [shape: f32[16,32], index: 0, kind: input, shape index: {}, may-alias: {0,4}]   ;;  %s105_s4 = inlined_call_operand.vmem [shape: f32[16,32], index: 4, kind: output, shape index: {}, may-alias: {0,4}]  }
   0x1   :  { %v17_v0 = vld [vmem:[%s101_s1] sm:$0xff]  ;;  %v18_v4 = vld [vmem:[%s101_s1 + $0x8] sm:$0xff] }
   0x2   :  { %v50_v1 = vld [vmem:[%s102_s2] ss:$0 sm:$0xff]  ;;  %v40_v10 = vld [vmem:[%s104_s0 + $0x8] sm:$0xff] }
   0x3   :  { %v51_v2 = vld [vmem:[%s103_s3] ss:$0 sm:$0xff]  ;;  %v26_v3 = vmul.f32 %v50_v1, %v17_v0  ;;  %v27_v5 = vmul.f32 %v50_v1, %v18_v4 }
   0x4   :  { %v39_v7 = vld [vmem:[%s104_s0] sm:$0xff] }
   0x5   :  { %v35_v6 = vadd.f32 %v51_v2, %v26_v3  ;;  %v36_v8 = vadd.f32 %v51_v2, %v27_v5 }
   0x7   :  { %v37_v9 = vmax.f32 %v35_v6, 0.0  ;;  %v38_v11 = vmax.f32 %v36_v8, 0.0 }
   0x9   :  { %v41_v12 = vadd.f32 %v39_v7, %v37_v9  ;;  %v42_v13 = vadd.f32 %v40_v10, %v38_v11 }
   0xb   :  { %44 = vst.msk [vmem:[%s105_s4] sm:$0xff] %vm43_vm0, %v41_v12  ;;  %45 = vst.msk [vmem:[%s105_s4 + $0x8] sm:$0xff] %vm43_vm0, %v42_v13 }

// kernel: transformer_forward.5
= control target key start
LH: loop header
LB: loop body
LE: loop exit
PB: predicated region body
PF: predicated region fallthrough
CT: control target
= control target key end

     0   :  { %v256_v0 = vmov 0.0   ;;  %vm257_vm0 = vmmov 0   ;;  %vm58_vm1 = vcmask 261120   ;;  %vm188_vm2 = vcmask 253952   ;;  %s363_s1 = inlined_call_operand.vmem [shape: bf16[32,32], index: 1, kind: input, shape index: {}]   ;;  %s364_s0 = inlined_call_operand.vmem [shape: bf16[16,32], index: 0, kind: input, shape index: {}]   ;;  %s365_s4 = inlined_call_operand.vmem [shape: bf16[32,32], index: 4, kind: input, shape index: {}]   ;;  %s366_s2 = inlined_call_operand.vmem [shape: f32[1,32], index: 2, kind: input, shape index: {}]   ;;  %s367_s3 = inlined_call_operand.vmem [shape: f32[16,32], index: 3, kind: input, shape index: {}]   ;;  %s368_s6 = inlined_call_operand.vmem [shape: f32[16,32], index: 6, kind: output, shape index: {0}]   ;;  %s369_s5 = inlined_call_operand.vmem [shape: f32[1,32], index: 5, kind: input, shape index: {}]   ;;  %s370_s7 = inlined_call_operand.vmem [shape: f32[16,32], index: 7, kind: output, shape index: {1}]   ;;  %s371_s8 = inlined_call_operand.vmem [shape: f32[1,1,32], index: 8, kind: output, shape index: {2}]   ;;  %s372_s9 = inlined_call_operand.vmem [shape: f32[1,1,32], index: 9, kind: output, shape index: {3}]  }
   0x1   :  { %233 = vmatprep.subr.bf16.mxu0 %v256_v0  ;;  %v251_v1 = vld [vmem:[%s363_s1] sm:$0xff]   ;;  %237 = vmatprep.mubr.msk.bf16.mxu0 %vm257_vm0, %v256_v0  ;;  %v252_v2 = vld [vmem:[%s363_s1 + $0x8] sm:$0xff]  }
   0x2   :  { %241 = vmatprep.subr.bf16.mxu1 %v256_v0  ;;  %245 = vmatprep.mubr.msk.bf16.mxu1 %vm257_vm0, %v256_v0  ;;  %v253_v3 = vld [vmem:[%s364_s0] sm:$0xff]   ;;  %v255_v5 = vld [vmem:[%s365_s4 + $0x8] sm:$0xff]  }
   0x3   :  { %234 = vmatpush3.bf16.msra.mxu0 %v251_v1  ;;  %v254_v4 = vld [vmem:[%s365_s4] sm:$0xff]   ;;  %v104_v12 = vld [vmem:[%s367_s3 + $0x8] sm:$0xff] }
   0x4   :  { %235 = vmatprep.subr.bf16.mxu0 %v256_v0  ;;  %242 = vmatpush3.bf16.msra.mxu1 %v254_v4  ;;  %v218_v6 = vld [vmem:[%s366_s2] ss:$0 sm:$0xff] }
   0x5   :  { %243 = vmatprep.subr.bf16.mxu1 %v256_v0  ;;  %v103_v8 = vld [vmem:[%s367_s3] sm:$0xff] }
   0x6   :  { %v223_v18 = vld [vmem:[%s369_s5] ss:$0 sm:$0xff] }
   0x7   :  { %236 = vmatpush3.bf16.msra.mxu0 %v252_v2 }
   0x8   :  { %244 = vmatpush3.bf16.msra.mxu1 %v255_v5 }
   0xa   :  { %238 = vmatmul.mubr.msk.bf16.vlgmr.msra.gmra.mrb[0].mxu0 %vm58_vm1, %v253_v3 }
  0xdd   :  { %v96_v7 = vpop.f32.mrb[0].mxu0 }
  0xde   :  { %v97_v9 = vadd.f32 %v218_v6, %v96_v7  ;;  %v239_v10 = vpop.f32.mrb[1].mxu0 }
  0xdf   :  { %v99_v11 = vpop.f32.mrb[2].mxu0 }
  0xe0   :  { %v105_v13 = vadd.f32 %v103_v8, %v97_v9  ;;  %v100_v14 = vadd.f32 %v218_v6, %v99_v11  ;;  %v240_v15 = vpop.f32.mrb[3].mxu0 }
  0xe2   :  { %175 = vst.msk [vmem:[%s368_s6] sm:$0xff] %vm58_vm1, %v105_v13  ;;  %v106_v16 = vadd.f32 %v104_v12, %v100_v14 }
  0xe4   :  { %v107_v17 = vpack.c.bf16 %v106_v16, %v105_v13  ;;  %176 = vst.msk [vmem:[%s368_s6 + $0x8] sm:$0xff] %vm58_vm1, %v106_v16 }
  0xe6   :  { %246 = vmatmul.mubr.msk.bf16.vlgmr.msra.gmra.mrb[0].mxu1 %vm58_vm1, %v107_v17 }
 0x1b9   :  { %v168_v19 = vpop.f32.mrb[0].mxu1 }
 0x1ba   :  { %v169_v20 = vadd.f32 %v223_v18, %v168_v19  ;;  %v247_v21 = vpop.f32.mrb[1].mxu1 }
 0x1bb   :  { %v171_v22 = vpop.f32.mrb[2].mxu1 }
 0x1bc   :  { %177 = vst.msk [vmem:[%s370_s7] sm:$0xff] %vm58_vm1, %v169_v20  ;;  %v190_v23 = vmul.f32 %v169_v20, %v169_v20  ;;  %v172_v24 = vadd.f32 %v223_v18, %v171_v22  ;;  %v248_v25 = vpop.f32.mrb[3].mxu1  ;;  %v179_v26 = vsel %vm58_vm1, %v169_v20, 0.0 }
 0x1be   :  { %178 = vst.msk [vmem:[%s370_s7 + $0x8] sm:$0xff] %vm58_vm1, %v172_v24  ;;  %v180_v27 = vsel %vm58_vm1, %v172_v24, 0.0  ;;  %v191_v28 = vmul.f32 %v172_v24, %v172_v24  ;;  %v192_v30 = vsel %vm58_vm1, %v190_v23, 0.0 }
 0x1bf   :  { %v181_v29 = vadd.f32 %v180_v27, %v179_v26 }
 0x1c0   :  { %v193_v31 = vsel %vm58_vm1, %v191_v28, 0.0 }
 0x1c1   :  { %v182_v32 = vrot.slane %v181_v29, 4  ;;  %v194_v33 = vadd.f32 %v193_v31, %v192_v30 }
 0x1c3   :  { %v183_v34 = vadd.f32 %v182_v32, %v181_v29  ;;  %v195_v35 = vrot.slane %v194_v33, 4 }
 0x1c5   :  { %v184_v36 = vrot.slane %v183_v34, 2  ;;  %v196_v37 = vadd.f32 %v195_v35, %v194_v33 }
 0x1c7   :  { %v185_v38 = vadd.f32 %v184_v36, %v183_v34  ;;  %v197_v39 = vrot.slane %v196_v37, 2 }
 0x1c9   :  { %v186_v40 = vrot.slane %v185_v38, 1  ;;  %v198_v41 = vadd.f32 %v197_v39, %v196_v37 }
 0x1cb   :  { %v187_v42 = vadd.f32 %v186_v40, %v185_v38  ;;  %v199_v43 = vrot.slane %v198_v41, 1 }
 0x1cd   :  { %189 = vst.msk [vmem:[%s371_s8] sm:$0x1] %vm188_vm2, %v187_v42  ;;  %v200_v44 = vadd.f32 %v199_v43, %v198_v41 }
 0x1cf   :  { %201 = vst.msk [vmem:[%s372_s9] sm:$0x1] %vm188_vm2, %v200_v44 }

// kernel: transformer_forward.4
= control target key start
LH: loop header
LB: loop body
LE: loop exit
PB: predicated region body
PF: predicated region fallthrough
CT: control target
= control target key end

     0   :  { %v1255_v0 = vmov 0.0   ;;  %vm1256_vm0 = vmmov 0   ;;  %vm41_vm1 = vcmask 261120   ;;  %s1258_s21 = smov 120   ;;  %s1259_s22 = smov 88   ;;  %vm93_vm2 = vcmask 64512   ;;  %s1504_s1 = inlined_call_operand.vmem [shape: bf16[32,96], index: 1, kind: input, shape index: {}]   ;;  %s1505_s0 = inlined_call_operand.vmem [shape: f32[16,32], index: 0, kind: input, shape index: {}]   ;;  %s1506_s2 = inlined_call_operand.vmem [shape: f32[1,96], index: 2, kind: input, shape index: {}]   ;;  %s1507_s3 = inlined_call_operand.vmem [shape: bf16[16,32], index: 3, kind: output, shape index: {}]  }
   0x1   :  { %1101 = vmatprep.subr.bf16.mxu0 %v1255_v0  ;;  %v1221_v1 = vld [vmem:[%s1504_s1] sm:$0xff]   ;;  %1105 = vmatprep.mubr.msk.bf16.mxu0 %vm1256_vm0, %v1255_v0  ;;  %v1222_v2 = vld [vmem:[%s1504_s1 + $0x8] sm:$0xff]   ;;  %s1260_s23 = smov 80   ;;  %s1262_s24 = smov 72   ;;  %vm157_vm3 = vcmask 1043456   ;;  %vm202_vm4 = vcmask 60416  }
   0x2   :  { %1109 = vmatprep.subr.bf16.mxu1 %v1255_v0  ;;  %1111 = vmatprep.mubr.msk.bf16.mxu1 %vm1256_vm0, %v1255_v0  ;;  %v15_v3 = vld [vmem:[%s1505_s0] sm:$0xff]  ;;  %v16_v4 = vld [vmem:[%s1505_s0 + $0x8] sm:$0xff]  ;;  %s1257_s0 = smov 96   ;;  %s1263_s25 = smov 104   ;;  %vm322_vm5 = vcmask 126016   ;;  %vm441_vm6 = vcmask 191616  }
   0x3   :  { %1102 = vmatpush3.bf16.msra.mxu0 %v1221_v1  ;;  %v17_v5 = vpack.c.bf16 %v16_v4, %v15_v3  ;;  %v1034_v6 = vld [vmem:[%s1506_s2] ss:$0 sm:$0xff]  ;;  %s1261_s2 = smov 112   ;;  %s1264_s26 = smov 56   ;;  %vm560_vm7 = vcmask 257216  }
   0x4   :  { %1103 = vmatprep.subr.bf16.mxu0 %v1255_v0  ;;  %s1265_s27 = smov 64   ;;  %s1266_s28 = smov 48  }
   0x5   :  { %s1267_s29 = smov 40   ;;  %s1268_s5 = smov 8  }
   0x6   :  { %s1269_s6 = smov 16   ;;  %s1270_s7 = smov 24  }
   0x7   :  { %1104 = vmatpush3.bf16.msra.mxu0 %v1222_v2 }
   0x8   :  { %1115 = vmatprep.subr.bf16.mxu0 %v1255_v0 }
   0xa   :  { %1106 = vmatmul.mubr.msk.bf16.vlgmr.msra.gmra.mrb[0].mxu0 %vm41_vm1, %v17_v5 }
   0xb   :  { %1117 = vmatprep.mubr.msk.bf16.mxu0 %vm1256_vm0, %v1255_v0 }
  0xdd   :  { %v79_v7 = vpop.f32.mrb[0].mxu0 }
  0xde   :  { %v80_v8 = vadd.f32 %v1034_v6, %v79_v7  ;;  %v1107_v9 = vpop.f32.mrb[1].mxu0 }
  0xdf   :  { %v82_v10 = vpop.f32.mrb[2].mxu0 }
  0xe0   :  { %v86_v11 = vmul.f32 0.35355338, %v80_v8  ;;  %v1316_v12 = vpack.c.bf16 %v80_v8, %v80_v8  ;;  %v1108_v13 = vpop.f32.mrb[3].mxu0  ;;  %v83_v15 = vadd.f32 %v1034_v6, %v82_v10 }
  0xe2   :  { %v88_v14 = vpack.c.bf16 %v86_v11, %v86_v11  ;;  %91 = vrot.lane.b32.xlu0 %v1316_v12, %s1257_s0  ;;  %v87_v16 = vmul.f32 0.35355338, %v83_v15  ;;  %v1322_v17 = vpack.c.bf16 %v83_v15, %v83_v15 }
  0xe4   :  { %205 = vrot.lane.b32.xlu1 %v88_v14, %s1258_s21  ;;  %v562_v18 = vpack.c.bf16 %v87_v16, %v87_v16 }
  0xe6   :  { %207 = vrot.lane.b32.xlu0 %v1316_v12, %s1259_s22 }
  0xe8   :  { %326 = vrot.lane.b32.xlu1 %v1316_v12, %s1260_s23 }
  0xea   :  { %324 = vrot.lane.b32.xlu0 %v88_v14, %s1261_s2 }
  0xec   :  { %445 = vrot.lane.b32.xlu1 %v1316_v12, %s1262_s24 }
  0xee   :  { %443 = vrot.lane.b32.xlu0 %v88_v14, %s1263_s25 }
  0xf0   :  { %565 = vrot.lane.b32.xlu1 %v1322_v17, %s1257_s0 }
  0xf2   :  { %678 = vrot.lane.b32.xlu0 %v1322_v17, %s1259_s22 }
  0xf4   :  { %676 = vrot.lane.b32.xlu1 %v562_v18, %s1258_s21 }
  0xf6   :  { %796 = vrot.lane.b32.xlu0 %v1322_v17, %s1260_s23 }
  0xf8   :  { %794 = vrot.lane.b32.xlu1 %v562_v18, %s1261_s2 }
  0xfa   :  { %914 = vrot.lane.b32.xlu0 %v1322_v17, %s1262_s24 }
  0xfc   :  { %912 = vrot.lane.b32.xlu1 %v562_v18, %s1263_s25 }
 0x154   :  { %v92_v19 = vpop.permute.xlu0 %91 }
 0x155   :  { %v98_v20 = vsel %vm93_vm2, %v92_v19, 0 }
 0x156   :  { %1110 = vmatpush3.bf16.xpose.msra.mxu1 %v98_v20  ;;  %v206_v22 = vpop.permute.xlu1 %205 }
 0x157   :  { %1121 = vmatprep.subr.bf16.mxu1 %v1255_v0 }
 0x158   :  { %v208_v21 = vpop.permute.xlu0 %207 }
 0x159   :  { %v213_v23 = vsel %vm93_vm2, %v208_v21, 0 }
 0x15a   :  { %v327_v24 = vpop.permute.xlu1 %326 }
 0x15b   :  { %v332_v25 = vsel %vm93_vm2, %v327_v24, 0 }
 0x15c   :  { %v325_v27 = vpop.permute.xlu0 %324 }
 0x15d   :  { %1112 = vmatmul.mubr.msk.bf16.vlgmr.msra.gmra.mrb[0].mxu1 %vm93_vm2, %v88_v14 }
 0x15e   :  { %1122 = vmatpush3.bf16.xpose.msra.mxu1 %v213_v23  ;;  %1123 = vmatprep.mubr.msk.bf16.mxu1 %vm1256_vm0, %v1255_v0  ;;  %v446_v26 = vpop.permute.xlu1 %445 }
 0x15f   :  { %1133 = vmatprep.subr.bf16.mxu1 %v1255_v0  ;;  %v451_v28 = vsel %vm93_vm2, %v446_v26, 0 }
 0x160   :  { %v444_v30 = vpop.permute.xlu0 %443 }
 0x162   :  { %v566_v29 = vpop.permute.xlu1 %565 }
 0x163   :  { %v571_v31 = vsel %vm93_vm2, %v566_v29, 0 }
 0x164   :  { %v679_v32 = vpop.permute.xlu0 %678 }
 0x165   :  { %1124 = vmatmul.mubr.msk.bf16.vlgmr.msra.gmra.mrb[4].mxu1 %vm93_vm2, %v206_v22  ;;  %v684_v33 = vsel %vm93_vm2, %v679_v32, 0 }
 0x166   :  { %1134 = vmatpush3.bf16.xpose.msra.mxu1 %v332_v25  ;;  %1135 = vmatprep.mubr.msk.bf16.mxu1 %vm1256_vm0, %v1255_v0  ;;  %v677_v35 = vpop.permute.xlu1 %676 }
 0x167   :  { %1145 = vmatprep.subr.bf16.mxu1 %v1255_v0 }
 0x168   :  { %v797_v34 = vpop.permute.xlu0 %796 }
 0x169   :  { %v802_v36 = vsel %vm93_vm2, %v797_v34, 0 }
 0x16a   :  { %v795_v38 = vpop.permute.xlu1 %794 }
 0x16c   :  { %v915_v37 = vpop.permute.xlu0 %914 }
 0x16d   :  { %1136 = vmatmul.mubr.msk.bf16.vlgmr.msra.gmra.mrb[8].mxu1 %vm93_vm2, %v325_v27  ;;  %v920_v39 = vsel %vm93_vm2, %v915_v37, 0 }
 0x16e   :  { %1146 = vmatpush3.bf16.xpose.msra.mxu1 %v451_v28  ;;  %1147 = vmatprep.mubr.msk.bf16.mxu1 %vm1256_vm0, %v1255_v0  ;;  %v913_v40 = vpop.permute.xlu1 %912 }
 0x16f   :  { %1157 = vmatprep.subr.bf16.mxu1 %v1255_v0 }
 0x175   :  { %1148 = vmatmul.mubr.msk.bf16.vlgmr.msra.gmra.mrb[12].mxu1 %vm93_vm2, %v444_v30 }
 0x176   :  { %1158 = vmatpush3.bf16.xpose.msra.mxu1 %v571_v31  ;;  %1159 = vmatprep.mubr.msk.bf16.mxu1 %vm1256_vm0, %v1255_v0 }
 0x177   :  { %1169 = vmatprep.subr.bf16.mxu1 %v1255_v0 }
 0x17d   :  { %1160 = vmatmul.mubr.msk.bf16.vlgmr.msra.gmra.mrb[16].mxu1 %vm93_vm2, %v562_v18 }
 0x17e   :  { %1170 = vmatpush3.bf16.xpose.msra.mxu1 %v684_v33  ;;  %1171 = vmatprep.mubr.msk.bf16.mxu1 %vm1256_vm0, %v1255_v0 }
 0x17f   :  { %1181 = vmatprep.subr.bf16.mxu1 %v1255_v0 }
 0x185   :  { %1172 = vmatmul.mubr.msk.bf16.vlgmr.msra.gmra.mrb[20].mxu1 %vm93_vm2, %v677_v35 }
 0x186   :  { %1182 = vmatpush3.bf16.xpose.msra.mxu1 %v802_v36  ;;  %1183 = vmatprep.mubr.msk.bf16.mxu1 %vm1256_vm0, %v1255_v0 }
 0x187   :  { %1193 = vmatprep.subr.bf16.mxu1 %v1255_v0 }
 0x18d   :  { %1184 = vmatmul.mubr.msk.bf16.vlgmr.msra.gmra.mrb[24].mxu1 %vm93_vm2, %v795_v38 }
 0x18e   :  { %1194 = vmatpush3.bf16.xpose.msra.mxu1 %v920_v39  ;;  %1195 = vmatprep.mubr.msk.bf16.mxu1 %vm1256_vm0, %v1255_v0 }
 0x195   :  { %1196 = vmatmul.mubr.msk.bf16.vlgmr.msra.gmra.mrb[28].mxu1 %vm93_vm2, %v913_v40 }
 0x230   :  { %v134_v41 = vpop.f32.mrb[0].mxu1 }
 0x231   :  { %v1113_v42 = vpop.f32.mrb[1].mxu1  ;;  %v140_v43 = vsel %vm93_vm2, %v134_v41, -inf }
 0x232   :  { %v137_v44 = vpop.f32.mrb[2].mxu1  ;;  %141 = vmax.xlane.f32.xlu0 %v140_v43 }
 0x233   :  { %v1114_v45 = vpop.f32.mrb[3].mxu1 }
 0x238   :  { %v249_v46 = vpop.f32.mrb[4].mxu1 }
 0x239   :  { %v1125_v47 = vpop.f32.mrb[5].mxu1  ;;  %v255_v48 = vsel %vm93_vm2, %v249_v46, -inf }
 0x23a   :  { %v252_v49 = vpop.f32.mrb[6].mxu1  ;;  %256 = vmax.xlane.f32.xlu1 %v255_v48 }
 0x23b   :  { %v1126_v50 = vpop.f32.mrb[7].mxu1 }
 0x240   :  { %v368_v51 = vpop.f32.mrb[8].mxu1 }
 0x241   :  { %v1137_v52 = vpop.f32.mrb[9].mxu1  ;;  %v374_v53 = vsel %vm93_vm2, %v368_v51, -inf }
 0x242   :  { %v371_v54 = vpop.f32.mrb[10].mxu1  ;;  %375 = vmax.xlane.f32.xlu0 %v374_v53 }
 0x243   :  { %v1138_v55 = vpop.f32.mrb[11].mxu1 }
 0x248   :  { %v1368_v56 = vpop.f32.mrb[12].mxu1 }
 0x249   :  { %v1149_v57 = vpop.f32.mrb[13].mxu1  ;;  %v493_v58 = vsel %vm93_vm2, %v1368_v56, -inf }
 0x24a   :  { %v490_v59 = vpop.f32.mrb[14].mxu1  ;;  %494 = vmax.xlane.f32.xlu0 %v493_v58 }
 0x24b   :  { %v1150_v60 = vpop.f32.mrb[15].mxu1 }
 0x250   :  { %v1372_v61 = vpop.f32.mrb[16].mxu1 }
 0x251   :  { %v1161_v62 = vpop.f32.mrb[17].mxu1  ;;  %v613_v63 = vsel %vm93_vm2, %v1372_v61, -inf }
 0x252   :  { %614 = vmax.xlane.f32.xlu1 %v613_v63  ;;  %v610_v1 = vpop.f32.mrb[18].mxu1 }
 0x253   :  { %v1162_v2 = vpop.f32.mrb[19].mxu1 }
 0x258   :  { %v1376_v3 = vpop.f32.mrb[20].mxu1 }
 0x259   :  { %v1173_v4 = vpop.f32.mrb[21].mxu1  ;;  %v726_v5 = vsel %vm93_vm2, %v1376_v3, -inf }
 0x25a   :  { %727 = vmax.xlane.f32.xlu0 %v726_v5  ;;  %v723_v6 = vpop.f32.mrb[22].mxu1 }
 0x25b   :  { %v1174_v7 = vpop.f32.mrb[23].mxu1 }
 0x260   :  { %v838_v8 = vpop.f32.mrb[24].mxu1 }
 0x261   :  { %v1185_v9 = vpop.f32.mrb[25].mxu1  ;;  %v844_v10 = vsel %vm93_vm2, %v838_v8, -inf }
 0x262   :  { %845 = vmax.xlane.f32.xlu1 %v844_v10  ;;  %v841_v11 = vpop.f32.mrb[26].mxu1 }
 0x263   :  { %v1186_v13 = vpop.f32.mrb[27].mxu1 }
 0x268   :  { %v1381_v14 = vpop.f32.mrb[28].mxu1 }
 0x269   :  { %v1197_v15 = vpop.f32.mrb[29].mxu1  ;;  %v962_v19 = vsel %vm93_vm2, %v1381_v14, -inf }
 0x26a   :  { %v959_v16 = vpop.f32.mrb[30].mxu1 }
 0x26b   :  { %v1198_v18 = vpop.f32.mrb[31].mxu1 }
 0x270   :  { %267 = vrot.lane.b32.xlu0 %v1316_v12, %s1264_s26 }
 0x273   :  { %152 = vrot.lane.b32.xlu1 %v1316_v12, %s1265_s27 }
 0x28f   :  { %963 = vmax.xlane.f32.xlu0 %v962_v19 }
 0x2bf   :  { %v142_v20 = vpop.xlane.xlu0 %141 }
 0x2c0   :  { %v143_v21 = vsub.f32 %v134_v41, %v142_v20 }
 0x2c2   :  { %v144_v22 = vmul.f32 1.442695, %v143_v21 }
 0x2c4   :  { %1223 = vpow2.f32 %v144_v22 }
 0x2c7   :  { %v257_v23 = vpop.xlane.xlu1 %256 }
 0x2c8   :  { %v258_v24 = vsub.f32 %v249_v46, %v257_v23 }
 0x2ca   :  { %v259_v25 = vmul.f32 1.442695, %v258_v24 }
 0x2cc   :  { %1225 = vpow2.f32 %v259_v25 }
 0x2ce   :  { %v1389_v26 = vpop.eup %1223 }
 0x2cf   :  { %v376_v27 = vpop.xlane.xlu0 %375  ;;  %v146_v28 = vsel %vm93_vm2, %v1389_v26, 0.0 }
 0x2d0   :  { %v377_v29 = vsub.f32 %v368_v51, %v376_v27  ;;  %147 = vadd.xlane.f32.xlu1 %v146_v28 }
 0x2d2   :  { %v378_v30 = vmul.f32 1.442695, %v377_v29 }
 0x2d4   :  { %1227 = vpow2.f32 %v378_v30 }
 0x2d6   :  { %v1393_v31 = vpop.eup %1225 }
 0x2d7   :  { %v261_v32 = vsel %vm93_vm2, %v1393_v31, 0.0  ;;  %v495_v38 = vpop.xlane.xlu0 %494 }
 0x2d8   :  { %262 = vadd.xlane.f32.xlu0 %v261_v32  ;;  %v496_v40 = vsub.f32 %v1368_v56, %v495_v38 }
 0x2da   :  { %v497_v41 = vmul.f32 1.442695, %v496_v40 }
 0x2dc   :  { %1229 = vpow2.f32 %v497_v41 }
 0x2de   :  { %v1397_v33 = vpop.eup %1227 }
 0x2df   :  { %v380_v34 = vsel %vm93_vm2, %v1397_v33, 0.0  ;;  %v615_v35 = vpop.xlane.xlu1 %614 }
 0x2e0   :  { %381 = vadd.xlane.f32.xlu1 %v380_v34  ;;  %v616_v42 = vsub.f32 %v1372_v61, %v615_v35 }
 0x2e2   :  { %v617_v45 = vmul.f32 1.442695, %v616_v42 }
 0x2e4   :  { %1231 = vpow2.f32 %v617_v45 }
 0x2e6   :  { %v1230_v48 = vpop.eup %1229 }
 0x2e7   :  { %v728_v43 = vpop.xlane.xlu0 %727  ;;  %v499_v49 = vsel %vm93_vm2, %v1230_v48, 0.0 }
 0x2e8   :  { %v729_v44 = vsub.f32 %v1376_v3, %v728_v43 }
 0x2eb   :  { %v268_v56 = vpop.permute.xlu0 %267 }
 0x2ec   :  { %v273_v4 = vsel %vm157_vm3, %v268_v56, 0 }
 0x2ee   :  { %386 = vrot.lane.b32.xlu0 %v1316_v12, %s1266_s28  ;;  %v1411_v50 = vpop.eup %1231 }
 0x2ef   :  { %v846_v36 = vpop.xlane.xlu1 %845  ;;  %v619_v52 = vsel %vm93_vm2, %v1411_v50, 0.0 }
 0x2f0   :  { %v847_v46 = vsub.f32 %v838_v8, %v846_v36 }
 0x2f1   :  { %505 = vrot.lane.b32.xlu1 %v1316_v12, %s1267_s29  ;;  %v730_v12 = vmul.f32 1.442695, %v729_v44 }
 0x2f2   :  { %v848_v47 = vmul.f32 1.442695, %v847_v46 }
 0x2f3   :  { %v153_v37 = vpop.permute.xlu1 %152  ;;  %1233 = vpow2.f32 %v730_v12 }
 0x2f4   :  { %v159_v39 = vsel %vm157_vm3, %v153_v37, 0  ;;  %1235 = vpow2.f32 %v848_v47 }
 0x2f5   :  { %1116 = vmatpush3.bf16.msra.mxu0 %v159_v39 }
 0x2f6   :  { %1127 = vmatprep.subr.bf16.mxu0 %v1255_v0 }
 0x2fd   :  { %v1413_v51 = vpop.eup %1233 }
 0x2fe   :  { %v1417_v53 = vpop.eup %1235  ;;  %v732_v54 = vsel %vm93_vm2, %v1413_v51, 0.0 }
 0x2ff   :  { %v850_v55 = vsel %vm93_vm2, %v1417_v53, 0.0 }
 0x30d   :  { %500 = vadd.xlane.f32.xlu0 %v499_v49 }
 0x311   :  { %620 = vadd.xlane.f32.xlu0 %v619_v52 }
 0x315   :  { %733 = vadd.xlane.f32.xlu1 %v732_v54  ;;  %851 = vadd.xlane.f32.xlu0 %v850_v55 }
 0x31c   :  { %v964_v57 = vpop.xlane.xlu0 %963 }
 0x31d   :  { %v965_v58 = vsub.f32 %v1381_v14, %v964_v57 }
 0x31f   :  { %v966_v59 = vmul.f32 1.442695, %v965_v58 }
 0x321   :  { %1237 = vpow2.f32 %v966_v59 }
 0x326   :  { %738 = vrot.lane.b32.xlu1 %v1322_v17, %s1264_s26 }
 0x32a   :  { %856 = vrot.lane.b32.xlu1 %v1322_v17, %s1266_s28 }
 0x32b   :  { %v1428_v60 = vpop.eup %1237 }
 0x32c   :  { %v968_v61 = vsel %vm93_vm2, %v1428_v60, 0.0 }
 0x32d   :  { %969 = vadd.xlane.f32.xlu0 %v968_v61 }
 0x32e   :  { %974 = vrot.lane.b32.xlu1 %v1322_v17, %s1267_s29 }
 0x343   :  { %625 = vrot.lane.b32.xlu0 %v1322_v17, %s1265_s27 }
 0x35d   :  { %v148_v62 = vpop.xlane.xlu1 %147 }
 0x35e   :  { %1239 = vrcp.f32 %v148_v62 }
 0x365   :  { %v263_v63 = vpop.xlane.xlu0 %262 }
 0x366   :  { %1241 = vrcp.f32 %v263_v63 }
 0x368   :  { %v1240_v1 = vpop.eup %1239 }
 0x369   :  { %v150_v2 = vmul.f32 %v1240_v1, %v1389_v26  ;;  %v387_v7 = vpop.permute.xlu0 %386 }
 0x36a   :  { %v392_v9 = vsel %vm157_vm3, %v387_v7, 0 }
 0x36b   :  { %v151_v3 = vpack.c.bf16 %v150_v2, %v150_v2 }
 0x36d   :  { %1118 = vmatmul.mubr.msk.bf16.vlgmr.msra.gmra.mrb[4].mxu0 %vm93_vm2, %v151_v3  ;;  %v382_v5 = vpop.xlane.xlu1 %381 }
 0x36e   :  { %1128 = vmatpush3.bf16.msra.mxu0 %v273_v4  ;;  %1243 = vrcp.f32 %v382_v5  ;;  %1129 = vmatprep.mubr.msk.bf16.mxu0 %vm1256_vm0, %v1255_v0 }
 0x36f   :  { %1139 = vmatprep.subr.bf16.mxu0 %v1255_v0 }
 0x370   :  { %v1242_v17 = vpop.eup %1241 }
 0x371   :  { %v265_v6 = vmul.f32 %v1242_v17, %v1393_v31  ;;  %v506_v13 = vpop.permute.xlu1 %505 }
 0x372   :  { %v511_v15 = vsel %vm157_vm3, %v506_v13, 0 }
 0x373   :  { %v266_v8 = vpack.c.bf16 %v265_v6, %v265_v6 }
 0x375   :  { %1130 = vmatmul.mubr.msk.bf16.vlgmr.msra.gmra.mrb[8].mxu0 %vm93_vm2, %v266_v8 }
 0x376   :  { %1140 = vmatpush3.bf16.msra.mxu0 %v392_v9  ;;  %1141 = vmatprep.mubr.msk.bf16.mxu0 %vm1256_vm0, %v1255_v0 }
 0x377   :  { %1151 = vmatprep.subr.bf16.mxu0 %v1255_v0 }
 0x378   :  { %v1244_v10 = vpop.eup %1243 }
 0x379   :  { %v384_v11 = vmul.f32 %v1244_v10, %v1397_v33 }
 0x37b   :  { %v385_v14 = vpack.c.bf16 %v384_v11, %v384_v11 }
 0x37d   :  { %1142 = vmatmul.mubr.msk.bf16.vlgmr.msra.gmra.mrb[12].mxu0 %vm93_vm2, %v385_v14 }
 0x37e   :  { %1152 = vmatpush3.bf16.msra.mxu0 %v511_v15  ;;  %1153 = vmatprep.mubr.msk.bf16.mxu0 %vm1256_vm0, %v1255_v0 }
 0x37f   :  { %1163 = vmatprep.subr.bf16.mxu0 %v1255_v0 }
 0x39a   :  { %v501_v16 = vpop.xlane.xlu0 %500 }
 0x39b   :  { %1245 = vrcp.f32 %v501_v16 }
 0x39e   :  { %v621_v21 = vpop.xlane.xlu0 %620 }
 0x39f   :  { %1247 = vrcp.f32 %v621_v21 }
 0x3a2   :  { %v734_v22 = vpop.xlane.xlu1 %733  ;;  %v852_v23 = vpop.xlane.xlu0 %851 }
 0x3a3   :  { %1249 = vrcp.f32 %v734_v22 }
 0x3a4   :  { %1251 = vrcp.f32 %v852_v23 }
 0x3a5   :  { %v1246_v18 = vpop.eup %1245 }
 0x3a6   :  { %v503_v19 = vmul.f32 %v1246_v18, %v1230_v48  ;;  %v739_v29 = vpop.permute.xlu1 %738 }
 0x3a7   :  { %v744_v32 = vsel %vm157_vm3, %v739_v29, 0 }
 0x3a8   :  { %v504_v20 = vpack.c.bf16 %v503_v19, %v503_v19 }
 0x3a9   :  { %v1248_v24 = vpop.eup %1247 }
 0x3aa   :  { %1154 = vmatmul.mubr.msk.bf16.vlgmr.msra.gmra.mrb[16].mxu0 %vm93_vm2, %v504_v20  ;;  %v623_v26 = vmul.f32 %v1248_v24, %v1411_v50  ;;  %v857_v34 = vpop.permute.xlu1 %856 }
 0x3ab   :  { %1165 = vmatprep.mubr.msk.bf16.mxu0 %vm1256_vm0, %v1255_v0  ;;  %v862_v37 = vsel %vm157_vm3, %v857_v34, 0 }
 0x3ac   :  { %v624_v30 = vpack.c.bf16 %v623_v26, %v623_v26 }
 0x3ad   :  { %v1250_v31 = vpop.eup %1249 }
 0x3ae   :  { %v736_v33 = vmul.f32 %v1250_v31, %v1413_v51  ;;  %v1252_v36 = vpop.eup %1251  ;;  %v975_v39 = vpop.permute.xlu1 %974 }
 0x3af   :  { %v854_v38 = vmul.f32 %v1252_v36, %v1417_v53  ;;  %v980_v42 = vsel %vm157_vm3, %v975_v39, 0 }
 0x3b0   :  { %v737_v35 = vpack.c.bf16 %v736_v33, %v736_v33 }
 0x3b1   :  { %v855_v40 = vpack.c.bf16 %v854_v38, %v854_v38 }
 0x3ba   :  { %v970_v25 = vpop.xlane.xlu0 %969 }
 0x3bb   :  { %1253 = vrcp.f32 %v970_v25 }
 0x3be   :  { %v626_v27 = vpop.permute.xlu0 %625 }
 0x3bf   :  { %v631_v28 = vsel %vm157_vm3, %v626_v27, 0 }
 0x3c0   :  { %1164 = vmatpush3.bf16.msra.mxu0 %v631_v28 }
 0x3c1   :  { %1175 = vmatprep.subr.bf16.mxu0 %v1255_v0 }
 0x3c3   :  { %1166 = vmatmul.mubr.msk.bf16.vlgmr.msra.gmra.mrb[20].mxu0 %vm93_vm2, %v624_v30 }
 0x3c4   :  { %1176 = vmatpush3.bf16.msra.mxu0 %v744_v32  ;;  %1177 = vmatprep.mubr.msk.bf16.mxu0 %vm1256_vm0, %v1255_v0 }
 0x3c5   :  { %1187 = vmatprep.subr.bf16.mxu0 %v1255_v0  ;;  %v1254_v41 = vpop.eup %1253 }
 0x3c6   :  { %v972_v43 = vmul.f32 %v1254_v41, %v1428_v60 }
 0x3c8   :  { %v973_v44 = vpack.c.bf16 %v972_v43, %v972_v43 }
 0x3cb   :  { %1178 = vmatmul.mubr.msk.bf16.vlgmr.msra.gmra.mrb[24].mxu0 %vm93_vm2, %v737_v35 }
 0x3cc   :  { %1188 = vmatpush3.bf16.msra.mxu0 %v862_v37  ;;  %1189 = vmatprep.mubr.msk.bf16.mxu0 %vm1256_vm0, %v1255_v0 }
 0x3cd   :  { %1199 = vmatprep.subr.bf16.mxu0 %v1255_v0 }
 0x3d3   :  { %1190 = vmatmul.mubr.msk.bf16.vlgmr.msra.gmra.mrb[28].mxu0 %vm93_vm2, %v855_v40 }
 0x3d4   :  { %1200 = vmatpush3.bf16.msra.mxu0 %v980_v42  ;;  %1201 = vmatprep.mubr.msk.bf16.mxu0 %vm1256_vm0, %v1255_v0 }
 0x3db   :  { %1202 = vmatmul.mubr.msk.bf16.vlgmr.msra.gmra.mrb[32].mxu0 %vm93_vm2, %v973_v44 }
 0x440   :  { %v195_v45 = vpop.f32.mrb[4].mxu0 }
 0x441   :  { %v201_v46 = vpack.c.bf16 %v195_v45, %v195_v45  ;;  %v1119_v12 = vpop.f32.mrb[5].mxu0 }
 0x442   :  { %v198_v47 = vpop.f32.mrb[6].mxu0 }
 0x443   :  { %203 = vst.msk [vmem:[%s1507_s3] sm:$0xf] %vm202_vm4, %v201_v46  ;;  %v1120_v48 = vpop.f32.mrb[7].mxu0 }
 0x448   :  { %v309_v49 = vpop.f32.mrb[8].mxu0 }
 0x449   :  { %v1060_v50 = vpack.c.bf16 %v309_v49, %v309_v49  ;;  %v1131_v51 = vpop.f32.mrb[9].mxu0 }
 0x44a   :  { %v312_v0 = vpop.f32.mrb[10].mxu0 }
 0x44b   :  { %319 = vrot.lane.b32.xlu1 %v1060_v50, %s1268_s5  ;;  %v1132_v52 = vpop.f32.mrb[11].mxu0 }
 0x450   :  { %v428_v53 = vpop.f32.mrb[12].mxu0 }
 0x451   :  { %v1061_v54 = vpack.c.bf16 %v428_v53, %v428_v53  ;;  %v1143_v55 = vpop.f32.mrb[13].mxu0 }
 0x452   :  { %v431_v56 = vpop.f32.mrb[14].mxu0 }
 0x453   :  { %438 = vrot.lane.b32.xlu1 %v1061_v54, %s1269_s6  ;;  %v1144_v57 = vpop.f32.mrb[15].mxu0 }
 0x47d   :  { %v547_v58 = vpop.f32.mrb[16].mxu0 }
 0x47e   :  { %v1062_v59 = vpack.c.bf16 %v547_v58, %v547_v58  ;;  %v1155_v60 = vpop.f32.mrb[17].mxu0 }
 0x47f   :  { %v550_v61 = vpop.f32.mrb[18].mxu0 }
 0x480   :  { %557 = vrot.lane.b32.xlu0 %v1062_v59, %s1270_s7  ;;  %v1156_v62 = vpop.f32.mrb[19].mxu0 }
 0x496   :  { %v667_v63 = vpop.f32.mrb[20].mxu0 }
 0x497   :  { %v673_v1 = vpack.c.bf16 %v667_v63, %v667_v63  ;;  %v1167_v2 = vpop.f32.mrb[21].mxu0 }
 0x498   :  { %v670_v3 = vpop.f32.mrb[22].mxu0 }
 0x499   :  { %674 = vst.msk [vmem:[%s1507_s3 + $0x4] sm:$0xf] %vm202_vm4, %v673_v1  ;;  %v1168_v4 = vpop.f32.mrb[23].mxu0 }
 0x49e   :  { %v780_v5 = vpop.f32.mrb[24].mxu0 }
 0x49f   :  { %v1063_v17 = vpack.c.bf16 %v780_v5, %v780_v5  ;;  %v1179_v6 = vpop.f32.mrb[25].mxu0 }
 0x4a0   :  { %v783_v7 = vpop.f32.mrb[26].mxu0 }
 0x4a1   :  { %790 = vrot.lane.b32.xlu1 %v1063_v17, %s1268_s5  ;;  %v1180_v8 = vpop.f32.mrb[27].mxu0 }
 0x4a6   :  { %v898_v9 = vpop.f32.mrb[28].mxu0 }
 0x4a7   :  { %v1064_v10 = vpack.c.bf16 %v898_v9, %v898_v9  ;;  %v1191_v11 = vpop.f32.mrb[29].mxu0 }
 0x4a8   :  { %v901_v13 = vpop.f32.mrb[30].mxu0 }
 0x4a9   :  { %908 = vrot.lane.b32.xlu0 %v1064_v10, %s1269_s6  ;;  %v1192_v14 = vpop.f32.mrb[31].mxu0 }
 0x4ae   :  { %v1016_v15 = vpop.f32.mrb[32].mxu0 }
 0x4af   :  { %v1065_v16 = vpack.c.bf16 %v1016_v15, %v1016_v15  ;;  %v1203_v18 = vpop.f32.mrb[33].mxu0 }
 0x4b0   :  { %v1019_v19 = vpop.f32.mrb[34].mxu0 }
 0x4b1   :  { %1026 = vrot.lane.b32.xlu1 %v1065_v16, %s1270_s7  ;;  %v1204_v20 = vpop.f32.mrb[35].mxu0 }
 0x4bd   :  { %v320_v21 = vpop.permute.xlu1 %319 }
 0x4be   :  { %323 = vst.msk [vmem:[%s1507_s3] sm:$0xf] %vm322_vm5, %v320_v21 }
 0x4c5   :  { %v439_v22 = vpop.permute.xlu1 %438 }
 0x4c6   :  { %442 = vst.msk [vmem:[%s1507_s3] sm:$0xf] %vm441_vm6, %v439_v22 }
 0x4f2   :  { %v558_v23 = vpop.permute.xlu0 %557 }
 0x4f3   :  { %561 = vst.msk [vmem:[%s1507_s3] sm:$0xf] %vm560_vm7, %v558_v23 }
 0x513   :  { %v791_v24 = vpop.permute.xlu1 %790 }
 0x514   :  { %793 = vst.msk [vmem:[%s1507_s3 + $0x4] sm:$0xf] %vm322_vm5, %v791_v24 }
 0x51b   :  { %v909_v25 = vpop.permute.xlu0 %908 }
 0x51c   :  { %911 = vst.msk [vmem:[%s1507_s3 + $0x4] sm:$0xf] %vm441_vm6, %v909_v25 }
 0x523   :  { %v1027_v26 = vpop.permute.xlu1 %1026 }
 0x524   :  { %1029 = vst.msk [vmem:[%s1507_s3 + $0x4] sm:$0xf] %vm560_vm7, %v1027_v26 }

</bundles_post_ra>
